<compile_context>
chip_gen: v6e
topology: v6e:2x2x1
jax: 0.10.0
libtpu: 0.0.40
codegen_flags: <defaults>
</compile_context>

<pallas_src>
import functools

import numpy as np
import jax
import jax.numpy as jnp
from jax.experimental import pallas as pl
from jax.experimental.pallas import tpu as pltpu


# Mini EfficientNet config (synthetic, deterministic weights):
#   stem  : 3 -> 8, conv3x3 s2
#   block1: MBConv expand=1, 8 -> 8,  dw3x3 s1, SE(2),  identity skip
#   block2: MBConv expand=6, 8 -> 16, dw3x3 s2, SE(2)
#   head  : 1x1 conv 16 -> 32 (== _conv_head.out_channels)
#   classifier: Linear(32, 1)
STEM_C, B1_C, B2_C, HEAD_C = 8, 8, 16, 32


# ----------------------------------------------------------------------------
# TF-SAME geometry helpers (host-side / trace-time constants)
# ----------------------------------------------------------------------------
def _same_pad(size, k, s):
    out = -(-size // s)                        # TF/EfficientNet SAME padding
    total = max((out - 1) * s + k - size, 0)
    return total // 2, total - total // 2, out


def _tap_select_matrix(h, w, k, stride):
    """0/1 matrix (k*k*OP, h*w): row t*OP + p selects the input pixel feeding
    tap t of flattened output position p (zero row when the tap lands in the
    TF-SAME padding).  Lets a depthwise conv run as ONE in-kernel gather
    matmul + 9 aligned slice-FMAs; no per-layer im2col/slab build in HBM."""
    pt, _, oh = _same_pad(h, k, stride)
    pw, _, ow = _same_pad(w, k, stride)
    op = oh * ow
    t = np.zeros((k * k, op, h * w), np.float32)
    for tap in range(k * k):
        di, dj = tap // k, tap % k
        for i in range(oh):
            for j in range(ow):
                ii = i * stride + di - pt
                jj = j * stride + dj - pw
                if 0 <= ii < h and 0 <= jj < w:
                    t[tap, i * ow + j, ii * w + jj] = 1.0
    return t.reshape(k * k * op, h * w), oh, ow


def _stem_patches(x_nhwc, k=3, stride=2):
    """One-time im2col of the RAW network input (tiny) so the stride-2 stem
    conv becomes a single in-kernel matmul.  Emitted directly in bf16 so no
    separate cast pass is needed."""
    n, h, w, _ = x_nhwc.shape
    pt, pb, oh = _same_pad(h, k, stride)
    pw0, pw1, ow = _same_pad(w, k, stride)
    xp = jnp.pad(x_nhwc, ((0, 0), (pt, pb), (pw0, pw1), (0, 0)))
    taps = []
    for di in range(k):
        for dj in range(k):
            taps.append(xp[:, di:di + stride * oh:stride,
                           dj:dj + stride * ow:stride, :])
    pat = jnp.stack(taps, axis=3)                      # (N, OH, OW, 9, Cin)
    return pat.reshape(n, oh * ow, k * k * x_nhwc.shape[-1]).astype(
        jnp.bfloat16), oh, ow


def fold_bn(bn, eps=1e-3):
    # inference BatchNorm folded into per-channel scale/bias (fused in-kernel)
    scale = bn["gamma"] / jnp.sqrt(bn["var"] + eps)
    bias = bn["beta"] - bn["mean"] * scale
    return scale, bias


def init_params(key):
    ks = iter(jax.random.split(key, 64))

    def nrm(shape, scale=0.1):
        return jax.random.normal(next(ks), shape, jnp.float32) * scale

    def bn(c):
        return dict(gamma=1.0 + nrm((c,), 0.05), beta=nrm((c,), 0.05),
                    mean=nrm((c,), 0.05), var=1.0 + jnp.abs(nrm((c,), 0.05)))

    p = {}
    p["stem_w"] = nrm((9 * 3, STEM_C)); p["stem_bn"] = bn(STEM_C)
    # block1: expand_ratio=1 -> no expand conv
    p["b1_dw_w"] = nrm((9, B1_C)); p["b1_dw_bn"] = bn(B1_C)
    p["b1_se_red_w"] = nrm((B1_C, 2)); p["b1_se_red_b"] = nrm((2,))
    p["b1_se_exp_w"] = nrm((2, B1_C)); p["b1_se_exp_b"] = nrm((B1_C,))
    p["b1_proj_w"] = nrm((B1_C, B1_C)); p["b1_proj_bn"] = bn(B1_C)
    # block2: expand_ratio=6 -> exp_c = 48
    exp_c = 6 * B1_C
    p["b2_exp_w"] = nrm((B1_C, exp_c)); p["b2_exp_bn"] = bn(exp_c)
    p["b2_dw_w"] = nrm((9, exp_c)); p["b2_dw_bn"] = bn(exp_c)
    p["b2_se_red_w"] = nrm((exp_c, 2)); p["b2_se_red_b"] = nrm((2,))
    p["b2_se_exp_w"] = nrm((2, exp_c)); p["b2_se_exp_b"] = nrm((exp_c,))
    p["b2_proj_w"] = nrm((exp_c, B2_C)); p["b2_proj_bn"] = bn(B2_C)
    # head conv + classifier
    p["head_w"] = nrm((B2_C, HEAD_C)); p["head_bn"] = bn(HEAD_C)
    p["cls_w"] = nrm((HEAD_C, 1)); p["cls_b"] = nrm((1,))
    return p


# ----------------------------------------------------------------------------
# The single fused Pallas kernel: whole forward pass for one image per step
# ----------------------------------------------------------------------------
def _effnet_fused_kernel(
    xp_ref,                               # (1, P1, 27) stem im2col patches bf16
    stem_w, stem_s, stem_b,               # stem conv + folded BN
    t1_ref, dw1_w, dw1_s, dw1_b,          # block1 dw3x3 s1 (tap-select + w)
    se1_rw, se1_rb, se1_ew, se1_eb,       # block1 squeeze-and-excite
    pj1_w, pj1_s, pj1_b,                  # block1 project + folded BN
    exp_w, exp_s, exp_b,                  # block2 expand 1x1 + folded BN
    t2_ref, dw2_w, dw2_s, dw2_b,          # block2 dw3x3 s2
    se2_rw, se2_rb, se2_ew, se2_eb,       # block2 squeeze-and-excite
    pj2_w, pj2_s, pj2_b,                  # block2 project + folded BN
    head_w, head_s, head_b,               # conv_head 1x1 + folded BN
    cls_w, cls_b,                         # classifier Linear(HEAD_C, 1)
    o_ref,                                # (1, 1, 1) logit
    *, p1, p2,
):
    """Entire EfficientNetGen forward for ONE image; every intermediate stays
    in VMEM/vregs.  bf16 MXU operands (cast in-kernel), f32 accumulation, f32
    elementwise epilogues; every BN is a folded scale/bias fused with swish."""

    def mm(a, b):
        return jnp.dot(a.astype(jnp.bfloat16), b.astype(jnp.bfloat16),
                       preferred_element_type=jnp.float32)

    def swish(v):
        return v * jax.nn.sigmoid(v)

    def dwconv(tsel, x, w9, npos):
        # tsel (9*npos, inpos) one-hot gather matrix (padding/stride baked in);
        # x (inpos, C); w9 (9, C) depthwise taps.
        taps = mm(tsel, x)                              # (9*npos, C) gathered
        acc = taps[0:npos, :] * w9[0]
        for t in range(1, 9):                           # aligned static slices
            acc = acc + taps[t * npos:(t + 1) * npos, :] * w9[t]
        return acc

    def se(x, rw, rb, ew, eb):
        g = jnp.mean(x, axis=0, keepdims=True)          # GAP -> (1, C)
        g = swish(mm(g, rw[...]) + rb[...])             # reduce + swish
        return jax.nn.sigmoid(mm(g, ew[...]) + eb[...])  # expand + sigmoid gate

    # ---- stem: conv3x3 s2 (+BN +swish); patches pre-gathered in wrapper ----
    h = swish(mm(xp_ref[0], stem_w[...]) * stem_s[...] + stem_b[...])

    # ---- MBConv block1: expand=1 -> dw3x3 s1 -> SE -> project (+id skip) ---
    d = swish(dwconv(t1_ref[...], h, dw1_w[...], p1) * dw1_s[...] + dw1_b[...])
    d = d * se(d, se1_rw, se1_rb, se1_ew, se1_eb)
    b1 = mm(d, pj1_w[...]) * pj1_s[...] + pj1_b[...] + h     # identity skip
    # (drop_connect is identity at eval)

    # ---- MBConv block2: expand=6 -> dw3x3 s2 -> SE -> project --------------
    e = swish(mm(b1, exp_w[...]) * exp_s[...] + exp_b[...])
    d2 = swish(dwconv(t2_ref[...], e, dw2_w[...], p2) * dw2_s[...] + dw2_b[...])
    d2 = d2 * se(d2, se2_rw, se2_rb, se2_ew, se2_eb)
    b2 = mm(d2, pj2_w[...]) * pj2_s[...] + pj2_b[...]        # no skip (stride 2)

    # ---- conv_head 1x1 + BN + swish -> GAP -> flatten -> dropout -> Linear -
    # TODO(synk): training-mode dropout (random mask) not implemented; eval
    # semantics (identity) used, matching model.eval().
    hh = swish(mm(b2, head_w[...]) * head_s[...] + head_b[...])
    feat = jnp.mean(hh, axis=0, keepdims=True)               # (1, HEAD_C)
    logit = jnp.sum(feat * cls_w[...], axis=1, keepdims=True) + cls_b[...]
    o_ref[0] = logit.astype(o_ref.dtype)


# ----------------------------------------------------------------------------
# Model forward (EfficientNetGen.forward, inference semantics)
# ----------------------------------------------------------------------------
def efficientnet_gen_forward(x_nchw, p):
    # layout: NCHW in (PyTorch) -> NHWC internally so channels map to lanes.
    x = jnp.transpose(x_nchw, (0, 2, 3, 1)).astype(jnp.float32)
    n = x.shape[0]

    xpat, oh0, ow0 = _stem_patches(x)                      # (N, P1, 27) bf16
    p1 = oh0 * ow0
    t1_np, oh1, ow1 = _tap_select_matrix(oh0, ow0, 3, 1)   # block1 dw, s=1
    t2_np, oh2, ow2 = _tap_select_matrix(oh1, ow1, 3, 2)   # block2 dw, s=2
    p2 = oh2 * ow2
    t1 = jnp.asarray(t1_np, jnp.bfloat16)                  # 0/1 exact in bf16
    t2 = jnp.asarray(t2_np, jnp.bfloat16)

    def row(v):                                            # (C,) -> (1, C) f32
        return v.reshape(1, -1).astype(jnp.float32)

    def wb(w):                                             # bf16 MXU operand
        return w.astype(jnp.bfloat16)

    ss, sb = fold_bn(p["stem_bn"])
    d1s, d1b = fold_bn(p["b1_dw_bn"])
    q1s, q1b = fold_bn(p["b1_proj_bn"])
    e2s, e2b = fold_bn(p["b2_exp_bn"])
    d2s, d2b = fold_bn(p["b2_dw_bn"])
    q2s, q2b = fold_bn(p["b2_proj_bn"])
    hs, hb = fold_bn(p["head_bn"])

    operands = [
        xpat,
        wb(p["stem_w"]), row(ss), row(sb),
        t1, p["b1_dw_w"].astype(jnp.float32), row(d1s), row(d1b),
        wb(p["b1_se_red_w"]), row(p["b1_se_red_b"]),
        wb(p["b1_se_exp_w"]), row(p["b1_se_exp_b"]),
        wb(p["b1_proj_w"]), row(q1s), row(q1b),
        wb(p["b2_exp_w"]), row(e2s), row(e2b),
        t2, p["b2_dw_w"].astype(jnp.float32), row(d2s), row(d2b),
        wb(p["b2_se_red_w"]), row(p["b2_se_red_b"]),
        wb(p["b2_se_exp_w"]), row(p["b2_se_exp_b"]),
        wb(p["b2_proj_w"]), row(q2s), row(q2b),
        wb(p["head_w"]), row(hs), row(hb),
        row(p["cls_w"][:, 0]), p["cls_b"].reshape(1, 1).astype(jnp.float32),
    ]

    # Activation block: one image per grid step.  Weight blocks: full array,
    # constant block index -> DMA'd once, resident in VMEM across the grid.
    in_specs = [pl.BlockSpec((1,) + xpat.shape[1:], lambda i: (i, 0, 0))]
    for a in operands[1:]:
        in_specs.append(pl.BlockSpec(a.shape, lambda i: (0, 0)))

    out = pl.pallas_call(
        functools.partial(_effnet_fused_kernel, p1=p1, p2=p2),
        out_shape=jax.ShapeDtypeStruct((n, 1, 1), jnp.float32),
        grid=(n,),
        in_specs=in_specs,
        out_specs=pl.BlockSpec((1, 1, 1), lambda i: (i, 0, 0)),
        compiler_params=pltpu.CompilerParams(
            dimension_semantics=("parallel",)),   # batch -> v7x dual-TC shard
    )(*operands)
    return out.reshape(n, 1)


if __name__ == "__main__":
    key = jax.random.PRNGKey(0)
    pkey, xkey = jax.random.split(key)
    params = init_params(pkey)
    x = jax.random.normal(xkey, (2, 3, 16, 16), jnp.float32)   # NCHW input
    fwd = jax.jit(efficientnet_gen_forward)
    out = fwd(x, params)
    jax.block_until_ready(out)
    assert out.shape == (2, 1) and out.dtype == jnp.float32
    print("KERNEL_OK")
</pallas_src>

<mosaic_0001>
module attributes {stable_mosaic.version = 11 : i64} {
  func.func @_effnet_fused_kernel(%arg0: i32, %arg1: memref<1x64x27xbf16, #tpu.memory_space<vmem>>, %arg2: memref<27x8xbf16, #tpu.memory_space<vmem>>, %arg3: memref<1x8xf32, #tpu.memory_space<vmem>>, %arg4: memref<1x8xf32, #tpu.memory_space<vmem>>, %arg5: memref<576x64xbf16, #tpu.memory_space<vmem>>, %arg6: memref<9x8xf32, #tpu.memory_space<vmem>>, %arg7: memref<1x8xf32, #tpu.memory_space<vmem>>, %arg8: memref<1x8xf32, #tpu.memory_space<vmem>>, %arg9: memref<8x2xbf16, #tpu.memory_space<vmem>>, %arg10: memref<1x2xf32, #tpu.memory_space<vmem>>, %arg11: memref<2x8xbf16, #tpu.memory_space<vmem>>, %arg12: memref<1x8xf32, #tpu.memory_space<vmem>>, %arg13: memref<8x8xbf16, #tpu.memory_space<vmem>>, %arg14: memref<1x8xf32, #tpu.memory_space<vmem>>, %arg15: memref<1x8xf32, #tpu.memory_space<vmem>>, %arg16: memref<8x48xbf16, #tpu.memory_space<vmem>>, %arg17: memref<1x48xf32, #tpu.memory_space<vmem>>, %arg18: memref<1x48xf32, #tpu.memory_space<vmem>>, %arg19: memref<144x64xbf16, #tpu.memory_space<vmem>>, %arg20: memref<9x48xf32, #tpu.memory_space<vmem>>, %arg21: memref<1x48xf32, #tpu.memory_space<vmem>>, %arg22: memref<1x48xf32, #tpu.memory_space<vmem>>, %arg23: memref<48x2xbf16, #tpu.memory_space<vmem>>, %arg24: memref<1x2xf32, #tpu.memory_space<vmem>>, %arg25: memref<2x48xbf16, #tpu.memory_space<vmem>>, %arg26: memref<1x48xf32, #tpu.memory_space<vmem>>, %arg27: memref<48x16xbf16, #tpu.memory_space<vmem>>, %arg28: memref<1x16xf32, #tpu.memory_space<vmem>>, %arg29: memref<1x16xf32, #tpu.memory_space<vmem>>, %arg30: memref<16x32xbf16, #tpu.memory_space<vmem>>, %arg31: memref<1x32xf32, #tpu.memory_space<vmem>>, %arg32: memref<1x32xf32, #tpu.memory_space<vmem>>, %arg33: memref<1x32xf32, #tpu.memory_space<vmem>>, %arg34: memref<1x1xf32, #tpu.memory_space<vmem>>, %arg35: memref<1x1x1xf32, #tpu.memory_space<vmem>>) attributes {dimension_semantics = [#tpu.dimension_semantics<parallel>], iteration_bounds = array<i64: 2>, scalar_prefetch = 0 : i64, scratch_operands = 0 : i64, tpu.core_type = #tpu.core_type<tc>, window_params = [{transform_indices = @transform_0, window_bounds = array<i64: 1, 64, 27>}, {pipeline_mode = #tpu.pipeline_mode<synchronous>, transform_indices = @transform_1, window_bounds = array<i64: 27, 8>}, {pipeline_mode = #tpu.pipeline_mode<synchronous>, transform_indices = @transform_2, window_bounds = array<i64: 1, 8>}, {pipeline_mode = #tpu.pipeline_mode<synchronous>, transform_indices = @transform_3, window_bounds = array<i64: 1, 8>}, {pipeline_mode = #tpu.pipeline_mode<synchronous>, transform_indices = @transform_4, window_bounds = array<i64: 576, 64>}, {pipeline_mode = #tpu.pipeline_mode<synchronous>, transform_indices = @transform_5, window_bounds = array<i64: 9, 8>}, {pipeline_mode = #tpu.pipeline_mode<synchronous>, transform_indices = @transform_6, window_bounds = array<i64: 1, 8>}, {pipeline_mode = #tpu.pipeline_mode<synchronous>, transform_indices = @transform_7, window_bounds = array<i64: 1, 8>}, {pipeline_mode = #tpu.pipeline_mode<synchronous>, transform_indices = @transform_8, window_bounds = array<i64: 8, 2>}, {pipeline_mode = #tpu.pipeline_mode<synchronous>, transform_indices = @transform_9, window_bounds = array<i64: 1, 2>}, {pipeline_mode = #tpu.pipeline_mode<synchronous>, transform_indices = @transform_10, window_bounds = array<i64: 2, 8>}, {pipeline_mode = #tpu.pipeline_mode<synchronous>, transform_indices = @transform_11, window_bounds = array<i64: 1, 8>}, {pipeline_mode = #tpu.pipeline_mode<synchronous>, transform_indices = @transform_12, window_bounds = array<i64: 8, 8>}, {pipeline_mode = #tpu.pipeline_mode<synchronous>, transform_indices = @transform_13, window_bounds = array<i64: 1, 8>}, {pipeline_mode = #tpu.pipeline_mode<synchronous>, transform_indices = @transform_14, window_bounds = array<i64: 1, 8>}, {pipeline_mode = #tpu.pipeline_mode<synchronous>, transform_indices = @transform_15, window_bounds = array<i64: 8, 48>}, {pipeline_mode = #tpu.pipeline_mode<synchronous>, transform_indices = @transform_16, window_bounds = array<i64: 1, 48>}, {pipeline_mode = #tpu.pipeline_mode<synchronous>, transform_indices = @transform_17, window_bounds = array<i64: 1, 48>}, {pipeline_mode = #tpu.pipeline_mode<synchronous>, transform_indices = @transform_18, window_bounds = array<i64: 144, 64>}, {pipeline_mode = #tpu.pipeline_mode<synchronous>, transform_indices = @transform_19, window_bounds = array<i64: 9, 48>}, {pipeline_mode = #tpu.pipeline_mode<synchronous>, transform_indices = @transform_20, window_bounds = array<i64: 1, 48>}, {pipeline_mode = #tpu.pipeline_mode<synchronous>, transform_indices = @transform_21, window_bounds = array<i64: 1, 48>}, {pipeline_mode = #tpu.pipeline_mode<synchronous>, transform_indices = @transform_22, window_bounds = array<i64: 48, 2>}, {pipeline_mode = #tpu.pipeline_mode<synchronous>, transform_indices = @transform_23, window_bounds = array<i64: 1, 2>}, {pipeline_mode = #tpu.pipeline_mode<synchronous>, transform_indices = @transform_24, window_bounds = array<i64: 2, 48>}, {pipeline_mode = #tpu.pipeline_mode<synchronous>, transform_indices = @transform_25, window_bounds = array<i64: 1, 48>}, {pipeline_mode = #tpu.pipeline_mode<synchronous>, transform_indices = @transform_26, window_bounds = array<i64: 48, 16>}, {pipeline_mode = #tpu.pipeline_mode<synchronous>, transform_indices = @transform_27, window_bounds = array<i64: 1, 16>}, {pipeline_mode = #tpu.pipeline_mode<synchronous>, transform_indices = @transform_28, window_bounds = array<i64: 1, 16>}, {pipeline_mode = #tpu.pipeline_mode<synchronous>, transform_indices = @transform_29, window_bounds = array<i64: 16, 32>}, {pipeline_mode = #tpu.pipeline_mode<synchronous>, transform_indices = @transform_30, window_bounds = array<i64: 1, 32>}, {pipeline_mode = #tpu.pipeline_mode<synchronous>, transform_indices = @transform_31, window_bounds = array<i64: 1, 32>}, {pipeline_mode = #tpu.pipeline_mode<synchronous>, transform_indices = @transform_32, window_bounds = array<i64: 1, 32>}, {pipeline_mode = #tpu.pipeline_mode<synchronous>, transform_indices = @transform_33, window_bounds = array<i64: 1, 1>}, {transform_indices = @transform_34, window_bounds = array<i64: 1, 1, 1>}]} {
    %c0 = arith.constant 0 : index
    %c0_0 = arith.constant 0 : index
    %c0_1 = arith.constant 0 : index
    %0 = vector.load %arg1[%c0, %c0_0, %c0_1] : memref<1x64x27xbf16, #tpu.memory_space<vmem>>, vector<1x64x27xbf16>
    %1 = vector.shape_cast %0 : vector<1x64x27xbf16> to vector<64x27xbf16>
    %c0_2 = arith.constant 0 : index
    %c0_3 = arith.constant 0 : index
    %2 = vector.load %arg2[%c0_2, %c0_3] : memref<27x8xbf16, #tpu.memory_space<vmem>>, vector<27x8xbf16>
    %cst = arith.constant dense<0.000000e+00> : vector<64x8xf32>
    %3 = tpu.matmul %1, %2, %cst {dimension_numbers = #tpu.dot_dimension_numbers<[1], [0], [0], [1], [0, 0, 1, 1], [], []>} : vector<64x27xbf16>, vector<27x8xbf16>, vector<64x8xf32> -> vector<64x8xf32>
    %c0_4 = arith.constant 0 : index
    %c0_5 = arith.constant 0 : index
    %4 = vector.load %arg3[%c0_4, %c0_5] : memref<1x8xf32, #tpu.memory_space<vmem>>, vector<1x8xf32>
    %5 = vector.broadcast %4 : vector<1x8xf32> to vector<64x8xf32>
    %6 = arith.mulf %3, %5 : vector<64x8xf32>
    %c0_6 = arith.constant 0 : index
    %c0_7 = arith.constant 0 : index
    %7 = vector.load %arg4[%c0_6, %c0_7] : memref<1x8xf32, #tpu.memory_space<vmem>>, vector<1x8xf32>
    %8 = vector.broadcast %7 : vector<1x8xf32> to vector<64x8xf32>
    %9 = arith.addf %6, %8 : vector<64x8xf32>
    %10 = arith.negf %9 : vector<64x8xf32>
    %11 = math.exp %10 : vector<64x8xf32>
    %cst_8 = arith.constant 1.000000e+00 : f32
    %12 = vector.broadcast %cst_8 : f32 to vector<64x8xf32>
    %13 = arith.addf %12, %11 : vector<64x8xf32>
    %14 = arith.divf %12, %13 : vector<64x8xf32>
    %15 = arith.mulf %9, %14 : vector<64x8xf32>
    %c0_9 = arith.constant 0 : index
    %c0_10 = arith.constant 0 : index
    %16 = vector.load %arg5[%c0_9, %c0_10] : memref<576x64xbf16, #tpu.memory_space<vmem>>, vector<576x64xbf16>
    %c0_11 = arith.constant 0 : index
    %c0_12 = arith.constant 0 : index
    %17 = vector.load %arg6[%c0_11, %c0_12] : memref<9x8xf32, #tpu.memory_space<vmem>>, vector<9x8xf32>
    %18 = arith.truncf %15 : vector<64x8xf32> to vector<64x8xbf16>
    %cst_13 = arith.constant dense<0.000000e+00> : vector<576x8xf32>
    %19 = tpu.matmul %16, %18, %cst_13 {dimension_numbers = #tpu.dot_dimension_numbers<[1], [0], [0], [1], [0, 0, 1, 1], [], []>} : vector<576x64xbf16>, vector<64x8xbf16>, vector<576x8xf32> -> vector<576x8xf32>
    %20 = vector.extract_strided_slice %19 {offsets = [0, 0], sizes = [64, 8], strides = [1, 1]} : vector<576x8xf32> to vector<64x8xf32>
    %21 = vector.extract_strided_slice %17 {offsets = [0, 0], sizes = [1, 8], strides = [1, 1]} : vector<9x8xf32> to vector<1x8xf32>
    %22 = vector.shape_cast %21 : vector<1x8xf32> to vector<8xf32>
    %23 = vector.shape_cast %22 : vector<8xf32> to vector<1x8xf32>
    %24 = vector.broadcast %23 : vector<1x8xf32> to vector<64x8xf32>
    %25 = arith.mulf %20, %24 : vector<64x8xf32>
    %26 = vector.extract_strided_slice %19 {offsets = [64, 0], sizes = [64, 8], strides = [1, 1]} : vector<576x8xf32> to vector<64x8xf32>
    %27 = vector.extract_strided_slice %17 {offsets = [1, 0], sizes = [1, 8], strides = [1, 1]} : vector<9x8xf32> to vector<1x8xf32>
    %28 = vector.shape_cast %27 : vector<1x8xf32> to vector<8xf32>
    %29 = vector.shape_cast %28 : vector<8xf32> to vector<1x8xf32>
    %30 = vector.broadcast %29 : vector<1x8xf32> to vector<64x8xf32>
    %31 = arith.mulf %26, %30 : vector<64x8xf32>
    %32 = arith.addf %25, %31 : vector<64x8xf32>
    %33 = vector.extract_strided_slice %19 {offsets = [128, 0], sizes = [64, 8], strides = [1, 1]} : vector<576x8xf32> to vector<64x8xf32>
    %34 = vector.extract_strided_slice %17 {offsets = [2, 0], sizes = [1, 8], strides = [1, 1]} : vector<9x8xf32> to vector<1x8xf32>
    %35 = vector.shape_cast %34 : vector<1x8xf32> to vector<8xf32>
    %36 = vector.shape_cast %35 : vector<8xf32> to vector<1x8xf32>
    %37 = vector.broadcast %36 : vector<1x8xf32> to vector<64x8xf32>
    %38 = arith.mulf %33, %37 : vector<64x8xf32>
    %39 = arith.addf %32, %38 : vector<64x8xf32>
    %40 = vector.extract_strided_slice %19 {offsets = [192, 0], sizes = [64, 8], strides = [1, 1]} : vector<576x8xf32> to vector<64x8xf32>
    %41 = vector.extract_strided_slice %17 {offsets = [3, 0], sizes = [1, 8], strides = [1, 1]} : vector<9x8xf32> to vector<1x8xf32>
    %42 = vector.shape_cast %41 : vector<1x8xf32> to vector<8xf32>
    %43 = vector.shape_cast %42 : vector<8xf32> to vector<1x8xf32>
    %44 = vector.broadcast %43 : vector<1x8xf32> to vector<64x8xf32>
    %45 = arith.mulf %40, %44 : vector<64x8xf32>
    %46 = arith.addf %39, %45 : vector<64x8xf32>
    %47 = vector.extract_strided_slice %19 {offsets = [256, 0], sizes = [64, 8], strides = [1, 1]} : vector<576x8xf32> to vector<64x8xf32>
    %48 = vector.extract_strided_slice %17 {offsets = [4, 0], sizes = [1, 8], strides = [1, 1]} : vector<9x8xf32> to vector<1x8xf32>
    %49 = vector.shape_cast %48 : vector<1x8xf32> to vector<8xf32>
    %50 = vector.shape_cast %49 : vector<8xf32> to vector<1x8xf32>
    %51 = vector.broadcast %50 : vector<1x8xf32> to vector<64x8xf32>
    %52 = arith.mulf %47, %51 : vector<64x8xf32>
    %53 = arith.addf %46, %52 : vector<64x8xf32>
    %54 = vector.extract_strided_slice %19 {offsets = [320, 0], sizes = [64, 8], strides = [1, 1]} : vector<576x8xf32> to vector<64x8xf32>
    %55 = vector.extract_strided_slice %17 {offsets = [5, 0], sizes = [1, 8], strides = [1, 1]} : vector<9x8xf32> to vector<1x8xf32>
    %56 = vector.shape_cast %55 : vector<1x8xf32> to vector<8xf32>
    %57 = vector.shape_cast %56 : vector<8xf32> to vector<1x8xf32>
    %58 = vector.broadcast %57 : vector<1x8xf32> to vector<64x8xf32>
    %59 = arith.mulf %54, %58 : vector<64x8xf32>
    %60 = arith.addf %53, %59 : vector<64x8xf32>
    %61 = vector.extract_strided_slice %19 {offsets = [384, 0], sizes = [64, 8], strides = [1, 1]} : vector<576x8xf32> to vector<64x8xf32>
    %62 = vector.extract_strided_slice %17 {offsets = [6, 0], sizes = [1, 8], strides = [1, 1]} : vector<9x8xf32> to vector<1x8xf32>
    %63 = vector.shape_cast %62 : vector<1x8xf32> to vector<8xf32>
    %64 = vector.shape_cast %63 : vector<8xf32> to vector<1x8xf32>
    %65 = vector.broadcast %64 : vector<1x8xf32> to vector<64x8xf32>
    %66 = arith.mulf %61, %65 : vector<64x8xf32>
    %67 = arith.addf %60, %66 : vector<64x8xf32>
    %68 = vector.extract_strided_slice %19 {offsets = [448, 0], sizes = [64, 8], strides = [1, 1]} : vector<576x8xf32> to vector<64x8xf32>
    %69 = vector.extract_strided_slice %17 {offsets = [7, 0], sizes = [1, 8], strides = [1, 1]} : vector<9x8xf32> to vector<1x8xf32>
    %70 = vector.shape_cast %69 : vector<1x8xf32> to vector<8xf32>
    %71 = vector.shape_cast %70 : vector<8xf32> to vector<1x8xf32>
    %72 = vector.broadcast %71 : vector<1x8xf32> to vector<64x8xf32>
    %73 = arith.mulf %68, %72 : vector<64x8xf32>
    %74 = arith.addf %67, %73 : vector<64x8xf32>
    %75 = vector.extract_strided_slice %19 {offsets = [512, 0], sizes = [64, 8], strides = [1, 1]} : vector<576x8xf32> to vector<64x8xf32>
    %76 = vector.extract_strided_slice %17 {offsets = [8, 0], sizes = [1, 8], strides = [1, 1]} : vector<9x8xf32> to vector<1x8xf32>
    %77 = vector.shape_cast %76 : vector<1x8xf32> to vector<8xf32>
    %78 = vector.shape_cast %77 : vector<8xf32> to vector<1x8xf32>
    %79 = vector.broadcast %78 : vector<1x8xf32> to vector<64x8xf32>
    %80 = arith.mulf %75, %79 : vector<64x8xf32>
    %81 = arith.addf %74, %80 : vector<64x8xf32>
    %c0_14 = arith.constant 0 : index
    %c0_15 = arith.constant 0 : index
    %82 = vector.load %arg7[%c0_14, %c0_15] : memref<1x8xf32, #tpu.memory_space<vmem>>, vector<1x8xf32>
    %83 = vector.broadcast %82 : vector<1x8xf32> to vector<64x8xf32>
    %84 = arith.mulf %81, %83 : vector<64x8xf32>
    %c0_16 = arith.constant 0 : index
    %c0_17 = arith.constant 0 : index
    %85 = vector.load %arg8[%c0_16, %c0_17] : memref<1x8xf32, #tpu.memory_space<vmem>>, vector<1x8xf32>
    %86 = vector.broadcast %85 : vector<1x8xf32> to vector<64x8xf32>
    %87 = arith.addf %84, %86 : vector<64x8xf32>
    %88 = arith.negf %87 : vector<64x8xf32>
    %89 = math.exp %88 : vector<64x8xf32>
    %cst_18 = arith.constant 1.000000e+00 : f32
    %90 = vector.broadcast %cst_18 : f32 to vector<64x8xf32>
    %91 = arith.addf %90, %89 : vector<64x8xf32>
    %92 = arith.divf %90, %91 : vector<64x8xf32>
    %93 = arith.mulf %87, %92 : vector<64x8xf32>
    %cst_19 = arith.constant dense<0.000000e+00> : vector<8xf32>
    %94 = vector.multi_reduction <add>, %93, %cst_19 [0] : vector<64x8xf32> to vector<8xf32>
    %95 = vector.shape_cast %94 : vector<8xf32> to vector<1x8xf32>
    %cst_20 = arith.constant 6.400000e+01 : f32
    %96 = vector.broadcast %cst_20 : f32 to vector<1x8xf32>
    %97 = arith.divf %95, %96 : vector<1x8xf32>
    %c0_21 = arith.constant 0 : index
    %c0_22 = arith.constant 0 : index
    %98 = vector.load %arg9[%c0_21, %c0_22] : memref<8x2xbf16, #tpu.memory_space<vmem>>, vector<8x2xbf16>
    %99 = arith.truncf %97 : vector<1x8xf32> to vector<1x8xbf16>
    %cst_23 = arith.constant dense<0.000000e+00> : vector<1x2xf32>
    %100 = tpu.matmul %99, %98, %cst_23 {dimension_numbers = #tpu.dot_dimension_numbers<[1], [0], [0], [1], [0, 0, 1, 1], [], []>} : vector<1x8xbf16>, vector<8x2xbf16>, vector<1x2xf32> -> vector<1x2xf32>
    %c0_24 = arith.constant 0 : index
    %c0_25 = arith.constant 0 : index
    %101 = vector.load %arg10[%c0_24, %c0_25] : memref<1x2xf32, #tpu.memory_space<vmem>>, vector<1x2xf32>
    %102 = arith.addf %100, %101 : vector<1x2xf32>
    %103 = arith.negf %102 : vector<1x2xf32>
    %104 = math.exp %103 : vector<1x2xf32>
    %cst_26 = arith.constant 1.000000e+00 : f32
    %105 = vector.broadcast %cst_26 : f32 to vector<1x2xf32>
    %106 = arith.addf %105, %104 : vector<1x2xf32>
    %107 = arith.divf %105, %106 : vector<1x2xf32>
    %108 = arith.mulf %102, %107 : vector<1x2xf32>
    %c0_27 = arith.constant 0 : index
    %c0_28 = arith.constant 0 : index
    %109 = vector.load %arg11[%c0_27, %c0_28] : memref<2x8xbf16, #tpu.memory_space<vmem>>, vector<2x8xbf16>
    %110 = arith.truncf %108 : vector<1x2xf32> to vector<1x2xbf16>
    %cst_29 = arith.constant dense<0.000000e+00> : vector<1x8xf32>
    %111 = tpu.matmul %110, %109, %cst_29 {dimension_numbers = #tpu.dot_dimension_numbers<[1], [0], [0], [1], [0, 0, 1, 1], [], []>} : vector<1x2xbf16>, vector<2x8xbf16>, vector<1x8xf32> -> vector<1x8xf32>
    %c0_30 = arith.constant 0 : index
    %c0_31 = arith.constant 0 : index
    %112 = vector.load %arg12[%c0_30, %c0_31] : memref<1x8xf32, #tpu.memory_space<vmem>>, vector<1x8xf32>
    %113 = arith.addf %111, %112 : vector<1x8xf32>
    %114 = arith.negf %113 : vector<1x8xf32>
    %115 = math.exp %114 : vector<1x8xf32>
    %cst_32 = arith.constant 1.000000e+00 : f32
    %116 = vector.broadcast %cst_32 : f32 to vector<1x8xf32>
    %117 = arith.addf %116, %115 : vector<1x8xf32>
    %118 = arith.divf %116, %117 : vector<1x8xf32>
    %119 = vector.broadcast %118 : vector<1x8xf32> to vector<64x8xf32>
    %120 = arith.mulf %93, %119 : vector<64x8xf32>
    %c0_33 = arith.constant 0 : index
    %c0_34 = arith.constant 0 : index
    %121 = vector.load %arg13[%c0_33, %c0_34] : memref<8x8xbf16, #tpu.memory_space<vmem>>, vector<8x8xbf16>
    %122 = arith.truncf %120 : vector<64x8xf32> to vector<64x8xbf16>
    %cst_35 = arith.constant dense<0.000000e+00> : vector<64x8xf32>
    %123 = tpu.matmul %122, %121, %cst_35 {dimension_numbers = #tpu.dot_dimension_numbers<[1], [0], [0], [1], [0, 0, 1, 1], [], []>} : vector<64x8xbf16>, vector<8x8xbf16>, vector<64x8xf32> -> vector<64x8xf32>
    %c0_36 = arith.constant 0 : index
    %c0_37 = arith.constant 0 : index
    %124 = vector.load %arg14[%c0_36, %c0_37] : memref<1x8xf32, #tpu.memory_space<vmem>>, vector<1x8xf32>
    %125 = vector.broadcast %124 : vector<1x8xf32> to vector<64x8xf32>
    %126 = arith.mulf %123, %125 : vector<64x8xf32>
    %c0_38 = arith.constant 0 : index
    %c0_39 = arith.constant 0 : index
    %127 = vector.load %arg15[%c0_38, %c0_39] : memref<1x8xf32, #tpu.memory_space<vmem>>, vector<1x8xf32>
    %128 = vector.broadcast %127 : vector<1x8xf32> to vector<64x8xf32>
    %129 = arith.addf %126, %128 : vector<64x8xf32>
    %130 = arith.addf %129, %15 : vector<64x8xf32>
    %c0_40 = arith.constant 0 : index
    %c0_41 = arith.constant 0 : index
    %131 = vector.load %arg16[%c0_40, %c0_41] : memref<8x48xbf16, #tpu.memory_space<vmem>>, vector<8x48xbf16>
    %132 = arith.truncf %130 : vector<64x8xf32> to vector<64x8xbf16>
    %cst_42 = arith.constant dense<0.000000e+00> : vector<64x48xf32>
    %133 = tpu.matmul %132, %131, %cst_42 {dimension_numbers = #tpu.dot_dimension_numbers<[1], [0], [0], [1], [0, 0, 1, 1], [], []>} : vector<64x8xbf16>, vector<8x48xbf16>, vector<64x48xf32> -> vector<64x48xf32>
    %c0_43 = arith.constant 0 : index
    %c0_44 = arith.constant 0 : index
    %134 = vector.load %arg17[%c0_43, %c0_44] : memref<1x48xf32, #tpu.memory_space<vmem>>, vector<1x48xf32>
    %135 = vector.broadcast %134 : vector<1x48xf32> to vector<64x48xf32>
    %136 = arith.mulf %133, %135 : vector<64x48xf32>
    %c0_45 = arith.constant 0 : index
    %c0_46 = arith.constant 0 : index
    %137 = vector.load %arg18[%c0_45, %c0_46] : memref<1x48xf32, #tpu.memory_space<vmem>>, vector<1x48xf32>
    %138 = vector.broadcast %137 : vector<1x48xf32> to vector<64x48xf32>
    %139 = arith.addf %136, %138 : vector<64x48xf32>
    %140 = arith.negf %139 : vector<64x48xf32>
    %141 = math.exp %140 : vector<64x48xf32>
    %cst_47 = arith.constant 1.000000e+00 : f32
    %142 = vector.broadcast %cst_47 : f32 to vector<64x48xf32>
    %143 = arith.addf %142, %141 : vector<64x48xf32>
    %144 = arith.divf %142, %143 : vector<64x48xf32>
    %145 = arith.mulf %139, %144 : vector<64x48xf32>
    %c0_48 = arith.constant 0 : index
    %c0_49 = arith.constant 0 : index
    %146 = vector.load %arg19[%c0_48, %c0_49] : memref<144x64xbf16, #tpu.memory_space<vmem>>, vector<144x64xbf16>
    %c0_50 = arith.constant 0 : index
    %c0_51 = arith.constant 0 : index
    %147 = vector.load %arg20[%c0_50, %c0_51] : memref<9x48xf32, #tpu.memory_space<vmem>>, vector<9x48xf32>
    %148 = arith.truncf %145 : vector<64x48xf32> to vector<64x48xbf16>
    %cst_52 = arith.constant dense<0.000000e+00> : vector<144x48xf32>
    %149 = tpu.matmul %146, %148, %cst_52 {dimension_numbers = #tpu.dot_dimension_numbers<[1], [0], [0], [1], [0, 0, 1, 1], [], []>} : vector<144x64xbf16>, vector<64x48xbf16>, vector<144x48xf32> -> vector<144x48xf32>
    %150 = vector.extract_strided_slice %149 {offsets = [0, 0], sizes = [16, 48], strides = [1, 1]} : vector<144x48xf32> to vector<16x48xf32>
    %151 = vector.extract_strided_slice %147 {offsets = [0, 0], sizes = [1, 48], strides = [1, 1]} : vector<9x48xf32> to vector<1x48xf32>
    %152 = vector.shape_cast %151 : vector<1x48xf32> to vector<48xf32>
    %153 = vector.shape_cast %152 : vector<48xf32> to vector<1x48xf32>
    %154 = vector.broadcast %153 : vector<1x48xf32> to vector<16x48xf32>
    %155 = arith.mulf %150, %154 : vector<16x48xf32>
    %156 = vector.extract_strided_slice %149 {offsets = [16, 0], sizes = [16, 48], strides = [1, 1]} : vector<144x48xf32> to vector<16x48xf32>
    %157 = vector.extract_strided_slice %147 {offsets = [1, 0], sizes = [1, 48], strides = [1, 1]} : vector<9x48xf32> to vector<1x48xf32>
    %158 = vector.shape_cast %157 : vector<1x48xf32> to vector<48xf32>
    %159 = vector.shape_cast %158 : vector<48xf32> to vector<1x48xf32>
    %160 = vector.broadcast %159 : vector<1x48xf32> to vector<16x48xf32>
    %161 = arith.mulf %156, %160 : vector<16x48xf32>
    %162 = arith.addf %155, %161 : vector<16x48xf32>
    %163 = vector.extract_strided_slice %149 {offsets = [32, 0], sizes = [16, 48], strides = [1, 1]} : vector<144x48xf32> to vector<16x48xf32>
    %164 = vector.extract_strided_slice %147 {offsets = [2, 0], sizes = [1, 48], strides = [1, 1]} : vector<9x48xf32> to vector<1x48xf32>
    %165 = vector.shape_cast %164 : vector<1x48xf32> to vector<48xf32>
    %166 = vector.shape_cast %165 : vector<48xf32> to vector<1x48xf32>
    %167 = vector.broadcast %166 : vector<1x48xf32> to vector<16x48xf32>
    %168 = arith.mulf %163, %167 : vector<16x48xf32>
    %169 = arith.addf %162, %168 : vector<16x48xf32>
    %170 = vector.extract_strided_slice %149 {offsets = [48, 0], sizes = [16, 48], strides = [1, 1]} : vector<144x48xf32> to vector<16x48xf32>
    %171 = vector.extract_strided_slice %147 {offsets = [3, 0], sizes = [1, 48], strides = [1, 1]} : vector<9x48xf32> to vector<1x48xf32>
    %172 = vector.shape_cast %171 : vector<1x48xf32> to vector<48xf32>
    %173 = vector.shape_cast %172 : vector<48xf32> to vector<1x48xf32>
    %174 = vector.broadcast %173 : vector<1x48xf32> to vector<16x48xf32>
    %175 = arith.mulf %170, %174 : vector<16x48xf32>
    %176 = arith.addf %169, %175 : vector<16x48xf32>
    %177 = vector.extract_strided_slice %149 {offsets = [64, 0], sizes = [16, 48], strides = [1, 1]} : vector<144x48xf32> to vector<16x48xf32>
    %178 = vector.extract_strided_slice %147 {offsets = [4, 0], sizes = [1, 48], strides = [1, 1]} : vector<9x48xf32> to vector<1x48xf32>
    %179 = vector.shape_cast %178 : vector<1x48xf32> to vector<48xf32>
    %180 = vector.shape_cast %179 : vector<48xf32> to vector<1x48xf32>
    %181 = vector.broadcast %180 : vector<1x48xf32> to vector<16x48xf32>
    %182 = arith.mulf %177, %181 : vector<16x48xf32>
    %183 = arith.addf %176, %182 : vector<16x48xf32>
    %184 = vector.extract_strided_slice %149 {offsets = [80, 0], sizes = [16, 48], strides = [1, 1]} : vector<144x48xf32> to vector<16x48xf32>
    %185 = vector.extract_strided_slice %147 {offsets = [5, 0], sizes = [1, 48], strides = [1, 1]} : vector<9x48xf32> to vector<1x48xf32>
    %186 = vector.shape_cast %185 : vector<1x48xf32> to vector<48xf32>
    %187 = vector.shape_cast %186 : vector<48xf32> to vector<1x48xf32>
    %188 = vector.broadcast %187 : vector<1x48xf32> to vector<16x48xf32>
    %189 = arith.mulf %184, %188 : vector<16x48xf32>
    %190 = arith.addf %183, %189 : vector<16x48xf32>
    %191 = vector.extract_strided_slice %149 {offsets = [96, 0], sizes = [16, 48], strides = [1, 1]} : vector<144x48xf32> to vector<16x48xf32>
    %192 = vector.extract_strided_slice %147 {offsets = [6, 0], sizes = [1, 48], strides = [1, 1]} : vector<9x48xf32> to vector<1x48xf32>
    %193 = vector.shape_cast %192 : vector<1x48xf32> to vector<48xf32>
    %194 = vector.shape_cast %193 : vector<48xf32> to vector<1x48xf32>
    %195 = vector.broadcast %194 : vector<1x48xf32> to vector<16x48xf32>
    %196 = arith.mulf %191, %195 : vector<16x48xf32>
    %197 = arith.addf %190, %196 : vector<16x48xf32>
    %198 = vector.extract_strided_slice %149 {offsets = [112, 0], sizes = [16, 48], strides = [1, 1]} : vector<144x48xf32> to vector<16x48xf32>
    %199 = vector.extract_strided_slice %147 {offsets = [7, 0], sizes = [1, 48], strides = [1, 1]} : vector<9x48xf32> to vector<1x48xf32>
    %200 = vector.shape_cast %199 : vector<1x48xf32> to vector<48xf32>
    %201 = vector.shape_cast %200 : vector<48xf32> to vector<1x48xf32>
    %202 = vector.broadcast %201 : vector<1x48xf32> to vector<16x48xf32>
    %203 = arith.mulf %198, %202 : vector<16x48xf32>
    %204 = arith.addf %197, %203 : vector<16x48xf32>
    %205 = vector.extract_strided_slice %149 {offsets = [128, 0], sizes = [16, 48], strides = [1, 1]} : vector<144x48xf32> to vector<16x48xf32>
    %206 = vector.extract_strided_slice %147 {offsets = [8, 0], sizes = [1, 48], strides = [1, 1]} : vector<9x48xf32> to vector<1x48xf32>
    %207 = vector.shape_cast %206 : vector<1x48xf32> to vector<48xf32>
    %208 = vector.shape_cast %207 : vector<48xf32> to vector<1x48xf32>
    %209 = vector.broadcast %208 : vector<1x48xf32> to vector<16x48xf32>
    %210 = arith.mulf %205, %209 : vector<16x48xf32>
    %211 = arith.addf %204, %210 : vector<16x48xf32>
    %c0_53 = arith.constant 0 : index
    %c0_54 = arith.constant 0 : index
    %212 = vector.load %arg21[%c0_53, %c0_54] : memref<1x48xf32, #tpu.memory_space<vmem>>, vector<1x48xf32>
    %213 = vector.broadcast %212 : vector<1x48xf32> to vector<16x48xf32>
    %214 = arith.mulf %211, %213 : vector<16x48xf32>
    %c0_55 = arith.constant 0 : index
    %c0_56 = arith.constant 0 : index
    %215 = vector.load %arg22[%c0_55, %c0_56] : memref<1x48xf32, #tpu.memory_space<vmem>>, vector<1x48xf32>
    %216 = vector.broadcast %215 : vector<1x48xf32> to vector<16x48xf32>
    %217 = arith.addf %214, %216 : vector<16x48xf32>
    %218 = arith.negf %217 : vector<16x48xf32>
    %219 = math.exp %218 : vector<16x48xf32>
    %cst_57 = arith.constant 1.000000e+00 : f32
    %220 = vector.broadcast %cst_57 : f32 to vector<16x48xf32>
    %221 = arith.addf %220, %219 : vector<16x48xf32>
    %222 = arith.divf %220, %221 : vector<16x48xf32>
    %223 = arith.mulf %217, %222 : vector<16x48xf32>
    %cst_58 = arith.constant dense<0.000000e+00> : vector<48xf32>
    %224 = vector.multi_reduction <add>, %223, %cst_58 [0] : vector<16x48xf32> to vector<48xf32>
    %225 = vector.shape_cast %224 : vector<48xf32> to vector<1x48xf32>
    %cst_59 = arith.constant 1.600000e+01 : f32
    %226 = vector.broadcast %cst_59 : f32 to vector<1x48xf32>
    %227 = arith.divf %225, %226 : vector<1x48xf32>
    %c0_60 = arith.constant 0 : index
    %c0_61 = arith.constant 0 : index
    %228 = vector.load %arg23[%c0_60, %c0_61] : memref<48x2xbf16, #tpu.memory_space<vmem>>, vector<48x2xbf16>
    %229 = arith.truncf %227 : vector<1x48xf32> to vector<1x48xbf16>
    %cst_62 = arith.constant dense<0.000000e+00> : vector<1x2xf32>
    %230 = tpu.matmul %229, %228, %cst_62 {dimension_numbers = #tpu.dot_dimension_numbers<[1], [0], [0], [1], [0, 0, 1, 1], [], []>} : vector<1x48xbf16>, vector<48x2xbf16>, vector<1x2xf32> -> vector<1x2xf32>
    %c0_63 = arith.constant 0 : index
    %c0_64 = arith.constant 0 : index
    %231 = vector.load %arg24[%c0_63, %c0_64] : memref<1x2xf32, #tpu.memory_space<vmem>>, vector<1x2xf32>
    %232 = arith.addf %230, %231 : vector<1x2xf32>
    %233 = arith.negf %232 : vector<1x2xf32>
    %234 = math.exp %233 : vector<1x2xf32>
    %cst_65 = arith.constant 1.000000e+00 : f32
    %235 = vector.broadcast %cst_65 : f32 to vector<1x2xf32>
    %236 = arith.addf %235, %234 : vector<1x2xf32>
    %237 = arith.divf %235, %236 : vector<1x2xf32>
    %238 = arith.mulf %232, %237 : vector<1x2xf32>
    %c0_66 = arith.constant 0 : index
    %c0_67 = arith.constant 0 : index
    %239 = vector.load %arg25[%c0_66, %c0_67] : memref<2x48xbf16, #tpu.memory_space<vmem>>, vector<2x48xbf16>
    %240 = arith.truncf %238 : vector<1x2xf32> to vector<1x2xbf16>
    %cst_68 = arith.constant dense<0.000000e+00> : vector<1x48xf32>
    %241 = tpu.matmul %240, %239, %cst_68 {dimension_numbers = #tpu.dot_dimension_numbers<[1], [0], [0], [1], [0, 0, 1, 1], [], []>} : vector<1x2xbf16>, vector<2x48xbf16>, vector<1x48xf32> -> vector<1x48xf32>
    %c0_69 = arith.constant 0 : index
    %c0_70 = arith.constant 0 : index
    %242 = vector.load %arg26[%c0_69, %c0_70] : memref<1x48xf32, #tpu.memory_space<vmem>>, vector<1x48xf32>
    %243 = arith.addf %241, %242 : vector<1x48xf32>
    %244 = arith.negf %243 : vector<1x48xf32>
    %245 = math.exp %244 : vector<1x48xf32>
    %cst_71 = arith.constant 1.000000e+00 : f32
    %246 = vector.broadcast %cst_71 : f32 to vector<1x48xf32>
    %247 = arith.addf %246, %245 : vector<1x48xf32>
    %248 = arith.divf %246, %247 : vector<1x48xf32>
    %249 = vector.broadcast %248 : vector<1x48xf32> to vector<16x48xf32>
    %250 = arith.mulf %223, %249 : vector<16x48xf32>
    %c0_72 = arith.constant 0 : index
    %c0_73 = arith.constant 0 : index
    %251 = vector.load %arg27[%c0_72, %c0_73] : memref<48x16xbf16, #tpu.memory_space<vmem>>, vector<48x16xbf16>
    %252 = arith.truncf %250 : vector<16x48xf32> to vector<16x48xbf16>
    %cst_74 = arith.constant dense<0.000000e+00> : vector<16x16xf32>
    %253 = tpu.matmul %252, %251, %cst_74 {dimension_numbers = #tpu.dot_dimension_numbers<[1], [0], [0], [1], [0, 0, 1, 1], [], []>} : vector<16x48xbf16>, vector<48x16xbf16>, vector<16x16xf32> -> vector<16x16xf32>
    %c0_75 = arith.constant 0 : index
    %c0_76 = arith.constant 0 : index
    %254 = vector.load %arg28[%c0_75, %c0_76] : memref<1x16xf32, #tpu.memory_space<vmem>>, vector<1x16xf32>
    %255 = vector.broadcast %254 : vector<1x16xf32> to vector<16x16xf32>
    %256 = arith.mulf %253, %255 : vector<16x16xf32>
    %c0_77 = arith.constant 0 : index
    %c0_78 = arith.constant 0 : index
    %257 = vector.load %arg29[%c0_77, %c0_78] : memref<1x16xf32, #tpu.memory_space<vmem>>, vector<1x16xf32>
    %258 = vector.broadcast %257 : vector<1x16xf32> to vector<16x16xf32>
    %259 = arith.addf %256, %258 : vector<16x16xf32>
    %c0_79 = arith.constant 0 : index
    %c0_80 = arith.constant 0 : index
    %260 = vector.load %arg30[%c0_79, %c0_80] : memref<16x32xbf16, #tpu.memory_space<vmem>>, vector<16x32xbf16>
    %261 = arith.truncf %259 : vector<16x16xf32> to vector<16x16xbf16>
    %cst_81 = arith.constant dense<0.000000e+00> : vector<16x32xf32>
    %262 = tpu.matmul %261, %260, %cst_81 {dimension_numbers = #tpu.dot_dimension_numbers<[1], [0], [0], [1], [0, 0, 1, 1], [], []>} : vector<16x16xbf16>, vector<16x32xbf16>, vector<16x32xf32> -> vector<16x32xf32>
    %c0_82 = arith.constant 0 : index
    %c0_83 = arith.constant 0 : index
    %263 = vector.load %arg31[%c0_82, %c0_83] : memref<1x32xf32, #tpu.memory_space<vmem>>, vector<1x32xf32>
    %264 = vector.broadcast %263 : vector<1x32xf32> to vector<16x32xf32>
    %265 = arith.mulf %262, %264 : vector<16x32xf32>
    %c0_84 = arith.constant 0 : index
    %c0_85 = arith.constant 0 : index
    %266 = vector.load %arg32[%c0_84, %c0_85] : memref<1x32xf32, #tpu.memory_space<vmem>>, vector<1x32xf32>
    %267 = vector.broadcast %266 : vector<1x32xf32> to vector<16x32xf32>
    %268 = arith.addf %265, %267 : vector<16x32xf32>
    %269 = arith.negf %268 : vector<16x32xf32>
    %270 = math.exp %269 : vector<16x32xf32>
    %cst_86 = arith.constant 1.000000e+00 : f32
    %271 = vector.broadcast %cst_86 : f32 to vector<16x32xf32>
    %272 = arith.addf %271, %270 : vector<16x32xf32>
    %273 = arith.divf %271, %272 : vector<16x32xf32>
    %274 = arith.mulf %268, %273 : vector<16x32xf32>
    %cst_87 = arith.constant dense<0.000000e+00> : vector<32xf32>
    %275 = vector.multi_reduction <add>, %274, %cst_87 [0] : vector<16x32xf32> to vector<32xf32>
    %276 = vector.shape_cast %275 : vector<32xf32> to vector<1x32xf32>
    %cst_88 = arith.constant 1.600000e+01 : f32
    %277 = vector.broadcast %cst_88 : f32 to vector<1x32xf32>
    %278 = arith.divf %276, %277 : vector<1x32xf32>
    %c0_89 = arith.constant 0 : index
    %c0_90 = arith.constant 0 : index
    %279 = vector.load %arg33[%c0_89, %c0_90] : memref<1x32xf32, #tpu.memory_space<vmem>>, vector<1x32xf32>
    %280 = arith.mulf %278, %279 : vector<1x32xf32>
    %cst_91 = arith.constant dense<0.000000e+00> : vector<1xf32>
    %281 = vector.multi_reduction <add>, %280, %cst_91 [1] : vector<1x32xf32> to vector<1xf32>
    %282 = vector.shape_cast %281 : vector<1xf32> to vector<1x1xf32>
    %c0_92 = arith.constant 0 : index
    %c0_93 = arith.constant 0 : index
    %283 = vector.load %arg34[%c0_92, %c0_93] : memref<1x1xf32, #tpu.memory_space<vmem>>, vector<1x1xf32>
    %284 = arith.addf %282, %283 : vector<1x1xf32>
    %c0_94 = arith.constant 0 : index
    %c0_95 = arith.constant 0 : index
    %c0_96 = arith.constant 0 : index
    %285 = vector.load %arg35[%c0_94, %c0_95, %c0_96] : memref<1x1x1xf32, #tpu.memory_space<vmem>>, vector<1x1x1xf32>
    %286 = vector.shape_cast %285 : vector<1x1x1xf32> to vector<1x1xf32>
    %287 = vector.shape_cast %284 : vector<1x1xf32> to vector<1x1x1xf32>
    tpu.vector_store %arg35[%c0_94, %c0_95, %c0_96], %287 {strides = array<i32>} : memref<1x1x1xf32, #tpu.memory_space<vmem>>, vector<1x1x1xf32>,
    return
  }
  func.func @transform_0(%arg0: i32) -> (i32, i32, i32) {
    %c0_i32 = arith.constant 0 : i32
    %c0_i32_0 = arith.constant 0 : i32
    %c0_i32_1 = arith.constant 0 : i32
    return %arg0, %c0_i32, %c0_i32_0 : i32, i32, i32
  }
  func.func @transform_1(%arg0: i32) -> (i32, i32) {
    %c0_i32 = arith.constant 0 : i32
    %c0_i32_0 = arith.constant 0 : i32
    %c0_i32_1 = arith.constant 0 : i32
    return %c0_i32, %c0_i32_0 : i32, i32
  }
  func.func @transform_2(%arg0: i32) -> (i32, i32) {
    %c0_i32 = arith.constant 0 : i32
    %c0_i32_0 = arith.constant 0 : i32
    %c0_i32_1 = arith.constant 0 : i32
    return %c0_i32, %c0_i32_0 : i32, i32
  }
  func.func @transform_3(%arg0: i32) -> (i32, i32) {
    %c0_i32 = arith.constant 0 : i32
    %c0_i32_0 = arith.constant 0 : i32
    %c0_i32_1 = arith.constant 0 : i32
    return %c0_i32, %c0_i32_0 : i32, i32
  }
  func.func @transform_4(%arg0: i32) -> (i32, i32) {
    %c0_i32 = arith.constant 0 : i32
    %c0_i32_0 = arith.constant 0 : i32
    %c0_i32_1 = arith.constant 0 : i32
    return %c0_i32, %c0_i32_0 : i32, i32
  }
  func.func @transform_5(%arg0: i32) -> (i32, i32) {
    %c0_i32 = arith.constant 0 : i32
    %c0_i32_0 = arith.constant 0 : i32
    %c0_i32_1 = arith.constant 0 : i32
    return %c0_i32, %c0_i32_0 : i32, i32
  }
  func.func @transform_6(%arg0: i32) -> (i32, i32) {
    %c0_i32 = arith.constant 0 : i32
    %c0_i32_0 = arith.constant 0 : i32
    %c0_i32_1 = arith.constant 0 : i32
    return %c0_i32, %c0_i32_0 : i32, i32
  }
  func.func @transform_7(%arg0: i32) -> (i32, i32) {
    %c0_i32 = arith.constant 0 : i32
    %c0_i32_0 = arith.constant 0 : i32
    %c0_i32_1 = arith.constant 0 : i32
    return %c0_i32, %c0_i32_0 : i32, i32
  }
  func.func @transform_8(%arg0: i32) -> (i32, i32) {
    %c0_i32 = arith.constant 0 : i32
    %c0_i32_0 = arith.constant 0 : i32
    %c0_i32_1 = arith.constant 0 : i32
    return %c0_i32, %c0_i32_0 : i32, i32
  }
  func.func @transform_9(%arg0: i32) -> (i32, i32) {
    %c0_i32 = arith.constant 0 : i32
    %c0_i32_0 = arith.constant 0 : i32
    %c0_i32_1 = arith.constant 0 : i32
    return %c0_i32, %c0_i32_0 : i32, i32
  }
  func.func @transform_10(%arg0: i32) -> (i32, i32) {
    %c0_i32 = arith.constant 0 : i32
    %c0_i32_0 = arith.constant 0 : i32
    %c0_i32_1 = arith.constant 0 : i32
    return %c0_i32, %c0_i32_0 : i32, i32
  }
  func.func @transform_11(%arg0: i32) -> (i32, i32) {
    %c0_i32 = arith.constant 0 : i32
    %c0_i32_0 = arith.constant 0 : i32
    %c0_i32_1 = arith.constant 0 : i32
    return %c0_i32, %c0_i32_0 : i32, i32
  }
  func.func @transform_12(%arg0: i32) -> (i32, i32) {
    %c0_i32 = arith.constant 0 : i32
    %c0_i32_0 = arith.constant 0 : i32
    %c0_i32_1 = arith.constant 0 : i32
    return %c0_i32, %c0_i32_0 : i32, i32
  }
  func.func @transform_13(%arg0: i32) -> (i32, i32) {
    %c0_i32 = arith.constant 0 : i32
    %c0_i32_0 = arith.constant 0 : i32
    %c0_i32_1 = arith.constant 0 : i32
    return %c0_i32, %c0_i32_0 : i32, i32
  }
  func.func @transform_14(%arg0: i32) -> (i32, i32) {
    %c0_i32 = arith.constant 0 : i32
    %c0_i32_0 = arith.constant 0 : i32
    %c0_i32_1 = arith.constant 0 : i32
    return %c0_i32, %c0_i32_0 : i32, i32
  }
  func.func @transform_15(%arg0: i32) -> (i32, i32) {
    %c0_i32 = arith.constant 0 : i32
    %c0_i32_0 = arith.constant 0 : i32
    %c0_i32_1 = arith.constant 0 : i32
    return %c0_i32, %c0_i32_0 : i32, i32
  }
  func.func @transform_16(%arg0: i32) -> (i32, i32) {
    %c0_i32 = arith.constant 0 : i32
    %c0_i32_0 = arith.constant 0 : i32
    %c0_i32_1 = arith.constant 0 : i32
    return %c0_i32, %c0_i32_0 : i32, i32
  }
  func.func @transform_17(%arg0: i32) -> (i32, i32) {
    %c0_i32 = arith.constant 0 : i32
    %c0_i32_0 = arith.constant 0 : i32
    %c0_i32_1 = arith.constant 0 : i32
    return %c0_i32, %c0_i32_0 : i32, i32
  }
  func.func @transform_18(%arg0: i32) -> (i32, i32) {
    %c0_i32 = arith.constant 0 : i32
    %c0_i32_0 = arith.constant 0 : i32
    %c0_i32_1 = arith.constant 0 : i32
    return %c0_i32, %c0_i32_0 : i32, i32
  }
  func.func @transform_19(%arg0: i32) -> (i32, i32) {
    %c0_i32 = arith.constant 0 : i32
    %c0_i32_0 = arith.constant 0 : i32
    %c0_i32_1 = arith.constant 0 : i32
    return %c0_i32, %c0_i32_0 : i32, i32
  }
  func.func @transform_20(%arg0: i32) -> (i32, i32) {
    %c0_i32 = arith.constant 0 : i32
    %c0_i32_0 = arith.constant 0 : i32
    %c0_i32_1 = arith.constant 0 : i32
    return %c0_i32, %c0_i32_0 : i32, i32
  }
  func.func @transform_21(%arg0: i32) -> (i32, i32) {
    %c0_i32 = arith.constant 0 : i32
    %c0_i32_0 = arith.constant 0 : i32
    %c0_i32_1 = arith.constant 0 : i32
    return %c0_i32, %c0_i32_0 : i32, i32
  }
  func.func @transform_22(%arg0: i32) -> (i32, i32) {
    %c0_i32 = arith.constant 0 : i32
    %c0_i32_0 = arith.constant 0 : i32
    %c0_i32_1 = arith.constant 0 : i32
    return %c0_i32, %c0_i32_0 : i32, i32
  }
  func.func @transform_23(%arg0: i32) -> (i32, i32) {
    %c0_i32 = arith.constant 0 : i32
    %c0_i32_0 = arith.constant 0 : i32
    %c0_i32_1 = arith.constant 0 : i32
    return %c0_i32, %c0_i32_0 : i32, i32
  }
  func.func @transform_24(%arg0: i32) -> (i32, i32) {
    %c0_i32 = arith.constant 0 : i32
    %c0_i32_0 = arith.constant 0 : i32
    %c0_i32_1 = arith.constant 0 : i32
    return %c0_i32, %c0_i32_0 : i32, i32
  }
  func.func @transform_25(%arg0: i32) -> (i32, i32) {
    %c0_i32 = arith.constant 0 : i32
    %c0_i32_0 = arith.constant 0 : i32
    %c0_i32_1 = arith.constant 0 : i32
    return %c0_i32, %c0_i32_0 : i32, i32
  }
  func.func @transform_26(%arg0: i32) -> (i32, i32) {
    %c0_i32 = arith.constant 0 : i32
    %c0_i32_0 = arith.constant 0 : i32
    %c0_i32_1 = arith.constant 0 : i32
    return %c0_i32, %c0_i32_0 : i32, i32
  }
  func.func @transform_27(%arg0: i32) -> (i32, i32) {
    %c0_i32 = arith.constant 0 : i32
    %c0_i32_0 = arith.constant 0 : i32
    %c0_i32_1 = arith.constant 0 : i32
    return %c0_i32, %c0_i32_0 : i32, i32
  }
  func.func @transform_28(%arg0: i32) -> (i32, i32) {
    %c0_i32 = arith.constant 0 : i32
    %c0_i32_0 = arith.constant 0 : i32
    %c0_i32_1 = arith.constant 0 : i32
    return %c0_i32, %c0_i32_0 : i32, i32
  }
  func.func @transform_29(%arg0: i32) -> (i32, i32) {
    %c0_i32 = arith.constant 0 : i32
    %c0_i32_0 = arith.constant 0 : i32
    %c0_i32_1 = arith.constant 0 : i32
    return %c0_i32, %c0_i32_0 : i32, i32
  }
  func.func @transform_30(%arg0: i32) -> (i32, i32) {
    %c0_i32 = arith.constant 0 : i32
    %c0_i32_0 = arith.constant 0 : i32
    %c0_i32_1 = arith.constant 0 : i32
    return %c0_i32, %c0_i32_0 : i32, i32
  }
  func.func @transform_31(%arg0: i32) -> (i32, i32) {
    %c0_i32 = arith.constant 0 : i32
    %c0_i32_0 = arith.constant 0 : i32
    %c0_i32_1 = arith.constant 0 : i32
    return %c0_i32, %c0_i32_0 : i32, i32
  }
  func.func @transform_32(%arg0: i32) -> (i32, i32) {
    %c0_i32 = arith.constant 0 : i32
    %c0_i32_0 = arith.constant 0 : i32
    %c0_i32_1 = arith.constant 0 : i32
    return %c0_i32, %c0_i32_0 : i32, i32
  }
  func.func @transform_33(%arg0: i32) -> (i32, i32) {
    %c0_i32 = arith.constant 0 : i32
    %c0_i32_0 = arith.constant 0 : i32
    %c0_i32_1 = arith.constant 0 : i32
    return %c0_i32, %c0_i32_0 : i32, i32
  }
  func.func @transform_34(%arg0: i32) -> (i32, i32, i32) {
    %c0_i32 = arith.constant 0 : i32
    %c0_i32_0 = arith.constant 0 : i32
    %c0_i32_1 = arith.constant 0 : i32
    return %arg0, %c0_i32, %c0_i32_0 : i32, i32, i32
  }
}

</mosaic_0001>

<bundles_post_ra>
// kernel: efficientnet_gen_forward.1
= control target key start
LH: loop header
LB: loop body
LE: loop exit
PB: predicated region body
PF: predicated region fallthrough
CT: control target
= control target key end

     0   :  { %s4078_s6 = smov 1   ;;  %s4079_s10 = smov 2   ;;  %s4741_s0 = inlined_call_operand.smem [shape: u32[35], index: -1, kind: input, shape index: {}] }
   0x1   :  { %s4123_s5 = sld [smem:[%s4741_s0]]   ;;  %s4080_s14 = smov 3  }
   0x2   :  { %s4128_s9 = sld [smem:[%s4741_s0 + %s4078_s6]]   ;;  %s4081_s18 = smov 4  }
   0x3   :  { %s4133_s13 = sld [smem:[%s4741_s0 + %s4079_s10]]   ;;  %s4082_s22 = smov 5  }
   0x4   :  { %s4138_s17 = sld [smem:[%s4741_s0 + %s4080_s14]]   ;;  %s4083_s26 = smov 6  }
   0x5   :  { %s4143_s21 = sld [smem:[%s4741_s0 + %s4081_s18]]   ;;  %s4084_s30 = smov 7  }
   0x6   :  { %s4148_s25 = sld [smem:[%s4741_s0 + %s4082_s22]]   ;;  %s4085_s4 = smov 8  }
   0x7   :  { %s4153_s29 = sld [smem:[%s4741_s0 + %s4083_s26]]   ;;  %s4086_s10 = smov 9  }
   0x8   :  { %s4158_s3 = sld [smem:[%s4741_s0 + %s4084_s30]]   ;;  %s4087_s15 = smov 10  }
   0x9   :  { %s4163_s8 = sld [smem:[%s4741_s0 + %s4085_s4]]   ;;  %s4088_s20 = smov 11  }
   0xa   :  { %s4168_s14 = sld [smem:[%s4741_s0 + %s4086_s10]]   ;;  %s4089_s26 = smov 12  }
   0xb   :  { %s4173_s19 = sld [smem:[%s4741_s0 + %s4087_s15]]   ;;  %s4090_s1 = smov 13  }
   0xc   :  { %s4178_s24 = sld [smem:[%s4741_s0 + %s4088_s20]]   ;;  %s4091_s7 = smov 14  }
   0xd   :  { %s4183_s30 = sld [smem:[%s4741_s0 + %s4089_s26]]   ;;  %s4092_s15 = smov 15  }
   0xe   :  { %s4188_s6 = sld [smem:[%s4741_s0 + %s4090_s1]]   ;;  %s4093_s22 = smov 16  }
   0xf   :  { %s4193_s12 = sld [smem:[%s4741_s0 + %s4091_s7]]   ;;  %s4094_s28 = smov 17  }
  0x10   :  { %s4198_s20 = sld [smem:[%s4741_s0 + %s4092_s15]]   ;;  %s4095_s7 = smov 18  }
  0x11   :  { %s4203_s27 = sld [smem:[%s4741_s0 + %s4093_s22]]   ;;  %s4096_s15 = smov 19  }
  0x12   :  { %s4208_s4 = sld [smem:[%s4741_s0 + %s4094_s28]]   ;;  %s4097_s22 = smov 20  }
  0x13   :  { %s4098_s28 = smov 21   ;;  %s4111_s10 = smov 34  }
  0x14   :  { %4751 = sst [smem:[#allocation3_spill]] %s4188_s6 }
  0x15   :  { %4752 = sst [smem:[#allocation4_spill]] %s4193_s12 }
  0x16   :  { %s4213_s12 = sld [smem:[%s4741_s0 + %s4095_s7]]   ;;  %s4099_s7 = smov 22  }
  0x17   :  { %4753 = sst [smem:[#allocation5_spill]] %s4203_s27 }
  0x18   :  { %4754 = sst [smem:[#allocation6_spill]] %s4208_s4 }
  0x19   :  { %s4218_s6 = sld [smem:[%s4741_s0 + %s4096_s15]]   ;;  %s4100_s15 = smov 23  }
  0x1a   :  { %s4223_s27 = sld [smem:[%s4741_s0 + %s4097_s22]]   ;;  %s4101_s22 = smov 24  }
  0x1b   :  { %s4228_s4 = sld [smem:[%s4741_s0 + %s4098_s28]]   ;;  %s4102_s28 = smov 25  }
  0x1c   :  { %4755 = sst [smem:[#allocation7_spill]] %s4213_s12 }
  0x1d   :  { %s4233_s12 = sld [smem:[%s4741_s0 + %s4099_s7]]   ;;  %s4103_s7 = smov 26  }
  0x1f   :  { %4756 = sst [smem:[#allocation8_spill]] %s4218_s6 }
  0x20   :  { %4757 = sst [smem:[#allocation9_spill]] %s4223_s27 }
  0x21   :  { %4758 = sst [smem:[#allocation10_spill]] %s4228_s4 }
  0x22   :  { %s4238_s6 = sld [smem:[%s4741_s0 + %s4100_s15]]   ;;  %s4104_s15 = smov 27  }
  0x23   :  { %4759 = sst [smem:[#allocation11_spill]] %s4233_s12 }
  0x24   :  { %s4243_s27 = sld [smem:[%s4741_s0 + %s4101_s22]]   ;;  %s4105_s22 = smov 28  }
  0x25   :  { %s4248_s4 = sld [smem:[%s4741_s0 + %s4102_s28]]   ;;  %s4106_s28 = smov 29  }
  0x26   :  { %s4253_s12 = sld [smem:[%s4741_s0 + %s4103_s7]]   ;;  %s4107_s7 = smov 30  }
  0x28   :  { %4760 = sst [smem:[#allocation12_spill]] %s4238_s6 }
  0x29   :  { %s4258_s6 = sld [smem:[%s4741_s0 + %s4104_s15]]   ;;  %s4108_s15 = smov 31  }
  0x2a   :  { %4761 = sst [smem:[#allocation13_spill]] %s4243_s27 }
  0x2b   :  { %4762 = sst [smem:[#allocation14_spill]] %s4248_s4 }
  0x2c   :  { %4763 = sst [smem:[#allocation15_spill]] %s4253_s12 }
  0x2d   :  { %s4263_s27 = sld [smem:[%s4741_s0 + %s4105_s22]]   ;;  %s4109_s22 = smov 32  }
  0x2e   :  { %s4268_s4 = sld [smem:[%s4741_s0 + %s4106_s28]]   ;;  %s4110_s28 = smov 33  }
  0x2f   :  { %4764 = sst [smem:[#allocation16_spill]] %s4258_s6 }
  0x30   :  { %s4273_s12 = sld [smem:[%s4741_s0 + %s4107_s7]]  }
  0x31   :  { %s4278_s6 = sld [smem:[%s4741_s0 + %s4108_s15]]   ;;  %s4293_s15 = smov 0  }
  0x33   :  { %4765 = sst [smem:[#allocation17_spill]] %s4263_s27 }
  0x34   :  { %4766 = sst [smem:[#allocation18_spill]] %s4268_s4 }
  0x35   :  { %s4283_s27 = sld [smem:[%s4741_s0 + %s4109_s22]]  }
  0x36   :  { %4767 = sst [smem:[#allocation19_spill]] %s4273_s12 }
  0x37   :  { %s3371_s4 = sld [smem:[%s4741_s0 + %s4110_s28]]  }
  0x38   :  { %s4291_s12 = sld [smem:[%s4741_s0 + %s4111_s10]]  }
  0x3d   :  { %v74_v0 = vstv %s3371_s4 }
  0x3e   :  { %75 = vst [vmem:[#allocation2] sm:$0x1] %v74_v0 }
  0x3f LB: > { %s3373_s16 = sadd.s32 4294967295, %s4076_s15   ;;  %p3377_p0 = scmp.ge.s32.totalorder %s4076_s15, 1  ;;  %s4076_s15 = sphi %s4293_s15, %s81_s15  }
  0x40   : > { %p949_p1 = scmp.lt.s32.totalorder %s4076_s15, 3 }
  0x42   : > { %p950_p2 = pnand %p3377_p0, %p949_p1 }
  0x43   : > { %p1033_p3 = scmp.lt.s32.totalorder (!%p950_p2), %s3373_s16, 1  ;;  %s4768_s18 = sld [smem:[#allocation3_spill]] (!%p950_p2) }
  0x44   : > { %953 = sbr.rel (%p950_p2) target bundleno = 3065 (0xbf9), region = 156  ;;  %s4769_s22 = sld [smem:[#allocation4_spill]] (!%p950_p2) }
  0x45   : > { %s4770_s23 = sld [smem:[#allocation5_spill]] (!%p950_p2) }
  0x46   : > { %s4771_s26 = sld [smem:[#allocation6_spill]] (!%p950_p2) }
  0x47   : > { %s4772_s28 = sld [smem:[#allocation7_spill]] (!%p950_p2) }
  0x48   : > { %s4773_s1 = sld [smem:[#allocation11_spill]] (!%p950_p2) }
  0x49   : > { %v3884_v1 = vld [vmem:[%s4128_s9 + $0x8] sm:$0x3f]   ;;  %vm1098_vm0 = vcmask 1044480   ;;  %vm1099_vm1 = vcmask 1045504   ;;  %v4112_v2 = vmov 65535   ;;  %v3885_v6 = vld [vmem:[%s4128_s9] sm:$0xff]  }
  0x4a   : > { %v1100_v3 = vsel %vm1098_vm0, 4294967295, %v4112_v2  ;;  %s4791_s16 = smov (!%p1033_p3, %s3373_s16), 1  ;;  %vm1085_vm2 = vcmask 220160   ;;  %v3890_v11 = vld [vmem:[%s4143_s21] sm:$0xff]   ;;  %vm1514_vm3 = vcmask 523264   ;;  %vm2232_vm4 = vcmask 1043456  }
  0x4b   : > { %v1101_v4 = vsel %vm1099_vm1, %v1100_v3, 0  ;;  %s3551_s0 = sshll.u32 %s4791_s16, 5  ;;  %3657 = vmatprep.mubr.msk.bf16.mxu1 %vm1514_vm3, %v3890_v11  ;;  %v3390_v14 = vld [vmem:[%s4133_s13] ss:$0 sm:$0xff]  ;;  %vm4114_vm5 = vmmov 0   ;;  %vm2202_vm6 = vcmask 64512  }
  0x4c   : > { %v1103_v5 = vand.u32 %v3884_v1, %v1101_v4  ;;  %s1037_s4 = scalar_lea.vmem %s4123_s5, %s3551_s0  ;;  %v3391_v19 = vld [vmem:[%s4138_s17] ss:$0 sm:$0xff]  ;;  %vm2290_vm7 = vcmask 1040384   ;;  %vm2286_vm8 = vcmask 15360   ;;  %s4774_s2 = sld [smem:[#allocation8_spill]]  ;;  %vm2949_vm9 = vcmask 392192  }
  0x4d   : > { %v3886_v7 = vld [vmem:[%s1037_s4] sm:$0xff]   ;;  %v3887_v8 = vld [vmem:[%s1037_s4 + $0x8] sm:$0xff]   ;;  %v3888_v9 = vld [vmem:[%s1037_s4 + $0x10] sm:$0xff]   ;;  %s4780_s10 = sld [smem:[#allocation9_spill]]  ;;  %vm3194_vm10 = vcmask 130048   ;;  %vm3271_vm11 = vcmask 261120  }
  0x4e   : > { %3637 = vmatprep.subr.bf16.mxu0 %v1103_v5  ;;  %3641 = vmatprep.mubr.msk.bf16.mxu0 %vm1085_vm2, %v3886_v7  ;;  %v3889_v10 = vld [vmem:[%s1037_s4 + $0x18] sm:$0xff]   ;;  %s4781_s7 = sld [smem:[#allocation10_spill]]  ;;  %vm3284_vm12 = vcmask 253952   ;;  %vm3290_vm13 = vcmask 0  }
  0x4f   : > { %3638 = vmatpush3.bf16.msra.mxu0 %v1103_v5  ;;  %s4782_s11 = sld [smem:[#allocation13_spill]] }
  0x50   : > { %3639 = vmatprep.subr.bf16.mxu0 %v3885_v6  ;;  %s4783_s0 = sld [smem:[#allocation15_spill]] }
  0x51   : > { %s4784_s4 = sld [smem:[#allocation12_spill]] }
  0x53   : > { %3640 = vmatpush3.bf16.msra.mxu0 %v3885_v6 }
  0x56   : > { %3642 = vmatmul.mubr.msk.bf16.vlgmr.msra.gmra.mxu0 %vm1085_vm2, %v3887_v8 }
  0x57   : > { %3645 = vmatprep.mubr.msk.bf16.mxu0 %vm1085_vm2, %v3888_v9 }
  0x5e   : > { %3646 = vmatmul.mubr.msk.bf16.gmra.mxu0 %vm1085_vm2, %v3889_v10 }
 0x116   : > { %v3643_v12 = vpop.f32.mrf.mxu0 }
 0x117   : > { %v1179_v17 = vmul.f32 %v3643_v12, %v3390_v14 }
 0x118   : > { %v1139_v13 = vpop.f32.mrf.mxu0 }
 0x119   : > { %v4313_v24 = vadd.f32 %v3391_v19, %v1179_v17  ;;  %v1177_v25 = vmul.f32 %v3390_v14, %v1139_v13 }
 0x11a   : > { %v3644_v15 = vpop.f32.mrf.mxu0 }
 0x11b   : > { %v1180_v16 = vmul.f32 %v3644_v15, %v3390_v14  ;;  %v3394_v35 = vmul.f32 -1.442695, %v4313_v24  ;;  %v4319_v36 = vadd.f32 %v3391_v19, %v1177_v25  ;;  %v3898_v25 = vld [vmem:[%s4143_s21 + $0x40] sm:$0xff]  }
 0x11c   : > { %v1142_v18 = vpop.f32.mrf.mxu0 }
 0x11d   : > { %v4311_v20 = vadd.f32 %v3391_v19, %v1180_v16  ;;  %v1178_v21 = vmul.f32 %v3390_v14, %v1142_v18  ;;  %v3392_v44 = vmul.f32 -1.442695, %v4319_v36  ;;  %v3891_v18 = vld [vmem:[%s4143_s21 + $0x8] sm:$0xff]  }
 0x11e   : > { %v3647_v22 = vpop.f32.mrf.mxu0 }
 0x11f   : > { %v1183_v23 = vmul.f32 %v3647_v22, %v3390_v14  ;;  %v3395_v29 = vmul.f32 -1.442695, %v4311_v20  ;;  %v4316_v30 = vadd.f32 %v3391_v19, %v1178_v21  ;;  %v3894_v21 = vld [vmem:[%s4143_s21 + $0x20] sm:$0xff]   ;;  %v3895_v22 = vld [vmem:[%s4143_s21 + $0x28] sm:$0xff]  }
 0x120   : > { %v1155_v26 = vpop.f32.mrf.mxu0 }
 0x121   : > { %v1198_v27 = vadd.f32 %v3391_v19, %v1183_v23  ;;  %v1181_v28 = vmul.f32 %v3390_v14, %v1155_v26  ;;  %v3393_v41 = vmul.f32 -1.442695, %v4316_v30  ;;  %v3896_v23 = vld [vmem:[%s4143_s21 + $0x30] sm:$0xff]   ;;  %v3899_v26 = vld [vmem:[%s4143_s21 + $0x48] sm:$0xff]  }
 0x122   : > { %v3648_v31 = vpop.f32.mrf.mxu0 }
 0x123   : > { %v3398_v32 = vmul.f32 -1.442695, %v1198_v27  ;;  %v1196_v33 = vadd.f32 %v3391_v19, %v1181_v28  ;;  %v1184_v34 = vmul.f32 %v3648_v31, %v3390_v14  ;;  %v3901_v28 = vld [vmem:[%s4143_s21 + $0x58] sm:$0xff]   ;;  %v3904_v31 = vld [vmem:[%s4143_s21 + $0x70] sm:$0xff]  }
 0x124   : > { %v1158_v37 = vpop.f32.mrf.mxu0 }
 0x125   : > { %3942 = vpow2.f32 %v3398_v32  ;;  %v3396_v38 = vmul.f32 -1.442695, %v1196_v33  ;;  %v1199_v39 = vadd.f32 %v3391_v19, %v1184_v34  ;;  %v1182_v40 = vmul.f32 %v3390_v14, %v1158_v37  ;;  %v3905_v32 = vld [vmem:[%s4143_s21 + $0x78] sm:$0xff]   ;;  %v3907_v34 = vld [vmem:[%s4143_s21 + $0x88] sm:$0xff]   ;;  %v3910_v37 = vld [vmem:[%s4143_s21 + $0xa0] sm:$0xff]  }
 0x126   : > { %3944 = vpow2.f32 %v3395_v29  ;;  %v3902_v29 = vld [vmem:[%s4143_s21 + $0x60] sm:$0xff]  }
 0x127   : > { %3946 = vpow2.f32 %v3396_v38  ;;  %v3399_v42 = vmul.f32 -1.442695, %v1199_v39  ;;  %v1197_v43 = vadd.f32 %v3391_v19, %v1182_v40  ;;  %v3892_v19 = vld [vmem:[%s4143_s21 + $0x10] sm:$0xff]   ;;  %v3911_v38 = vld [vmem:[%s4143_s21 + $0xa8] sm:$0xff]   ;;  %v3913_v40 = vld [vmem:[%s4143_s21 + $0xb8] sm:$0xff]  }
 0x128   : > { %3948 = vpow2.f32 %v3394_v35  ;;  %v3908_v35 = vld [vmem:[%s4143_s21 + $0x90] sm:$0xff]  }
 0x129   : > { %3950 = vpow2.f32 %v3399_v42  ;;  %v3397_v45 = vmul.f32 -1.442695, %v1197_v43  ;;  %v3915_v42 = vld [vmem:[%s4143_s21 + $0xc8] sm:$0xff]  }
 0x12a   : > { %3952 = vpow2.f32 %v3393_v41  ;;  %v3914_v41 = vld [vmem:[%s4143_s21 + $0xc0] sm:$0xff]  }
 0x12b   : > { %3954 = vpow2.f32 %v3397_v45  ;;  %v3918_v45 = vld [vmem:[%s4143_s21 + $0xe0] sm:$0xff]  }
 0x12c   : > { %3956 = vpow2.f32 %v3392_v44  ;;  %v3917_v44 = vld [vmem:[%s4143_s21 + $0xd8] sm:$0xff]  }
 0x132   : > { %v3943_v46 = vpop.eup %3942 }
 0x133   : > { %v3945_v47 = vpop.eup %3944  ;;  %v1230_v48 = vadd.f32 1.0, %v3943_v46  ;;  %v3919_v46 = vld [vmem:[%s4143_s21 + $0xe8] sm:$0xff]  }
 0x134   : > { %v3947_v49 = vpop.eup %3946  ;;  %v1227_v53 = vadd.f32 1.0, %v3945_v47  ;;  %v3920_v47 = vld [vmem:[%s4143_s21 + $0xf0] sm:$0xff]  }
 0x135   : > { %v3949_v50 = vpop.eup %3948  ;;  %v1228_v51 = vadd.f32 1.0, %v3947_v49  ;;  %3958 = vrcp.f32 %v1230_v48  ;;  %v3921_v48 = vld [vmem:[%s4143_s21 + $0xf8] sm:$0xff]   ;;  %v3922_v49 = vld [vmem:[%s4143_s21 + $0x100] sm:$0xff]  }
 0x136   : > { %v3951_v52 = vpop.eup %3950  ;;  %v1226_v57 = vadd.f32 1.0, %v3949_v50  ;;  %v3923_v50 = vld [vmem:[%s4143_s21 + $0x108] sm:$0xff]  }
 0x137   : > { %v3953_v54 = vpop.eup %3952  ;;  %v1231_v55 = vadd.f32 1.0, %v3951_v52  ;;  %3960 = vrcp.f32 %v1228_v51  ;;  %v3924_v51 = vld [vmem:[%s4143_s21 + $0x110] sm:$0xff]   ;;  %v3925_v52 = vld [vmem:[%s4143_s21 + $0x118] sm:$0xff]  }
 0x138   : > { %v3955_v56 = vpop.eup %3954  ;;  %v1225_v60 = vadd.f32 1.0, %v3953_v54  ;;  %v1944_v54 = vlaneseq }
 0x139   : > { %3962 = vrcp.f32 %v1231_v55  ;;  %v1229_v58 = vadd.f32 1.0, %v3955_v56  ;;  %v3957_v59 = vpop.eup %3956 }
 0x13a   : > { %3964 = vrcp.f32 %v1227_v53  ;;  %v1224_v61 = vadd.f32 1.0, %v3957_v59 }
 0x13b   : > { %3966 = vrcp.f32 %v1229_v58 }
 0x13c   : > { %3968 = vrcp.f32 %v1226_v57  ;;  %v4421_v57 = vshrl.u32 %v1944_v54, 7 }
 0x13d   : > { %3970 = vrcp.f32 %v1225_v60 }
 0x13e   : > { %3972 = vrcp.f32 %v1224_v61  ;;  %v4424_v60 = vsub.s32 0, %v4421_v57  ;;  %v1958_v61 = vsub.s32 1, %v4421_v57 }
 0x142   : > { %v3959_v62 = vpop.eup %3958 }
 0x143   : > { %v4323_v2 = vmul.f32 %v3959_v62, %v1198_v27  ;;  %v3900_v27 = vld [vmem:[%s4143_s21 + $0x50] sm:$0xff]   ;;  %v4428_v62 = vld [vmem:[%s4148_s25] sm:$0xff] }
 0x144   : > { %v3961_v63 = vpop.eup %3960 }
 0x145   : > { %v4327_v5 = vmul.f32 %v3961_v63, %v1196_v33  ;;  %v3906_v33 = vld [vmem:[%s4143_s21 + $0x80] sm:$0xff]  }
 0x146   : > { %v3963_v0 = vpop.eup %3962 }
 0x147   : > { %v3965_v1 = vpop.eup %3964  ;;  %v4325_v3 = vmul.f32 %v3963_v0, %v1199_v39  ;;  %v3912_v39 = vld [vmem:[%s4143_s21 + $0xb0] sm:$0xff]  }
 0x148   : > { %v3967_v4 = vpop.eup %3966  ;;  %v4334_v9 = vmul.f32 %v3965_v1, %v4311_v20  ;;  %v3893_v20 = vld [vmem:[%s4143_s21 + $0x18] sm:$0xff]   ;;  %v1947_v1 = vrot.slane %v4428_v62, %v4424_v60 }
 0x149   : > { %v4329_v6 = vmul.f32 %v3967_v4, %v1197_v43  ;;  %v1333_v7 = vpack.c.bf16 %v4325_v3, %v4323_v2  ;;  %v3969_v8 = vpop.eup %3968  ;;  %v3916_v43 = vld [vmem:[%s4143_s21 + $0xd0] sm:$0xff]   ;;  %v1959_v4 = vrot.slane %v4428_v62, %v1958_v61 }
 0x14a   : > { %v3971_v11 = vpop.eup %3970  ;;  %v4339_v12 = vmul.f32 %v3969_v8, %v4313_v24  ;;  %v3897_v24 = vld [vmem:[%s4143_s21 + $0x38] sm:$0xff]  }
 0x14b   : > { %3649 = vmatprep.subr.bf16.mxu1 %v1333_v7  ;;  %v1332_v10 = vpack.c.bf16 %v4329_v6, %v4327_v5  ;;  %v3973_v13 = vpop.eup %3972  ;;  %v4342_v14 = vmul.f32 %v3971_v11, %v4316_v30  ;;  %v3903_v30 = vld [vmem:[%s4143_s21 + $0x68] sm:$0xff]  }
 0x14c   : > { %3650 = vmatpush3.bf16.msra.mxu1 %v1333_v7  ;;  %v1331_v15 = vpack.c.bf16 %v4334_v9, %v4339_v12  ;;  %v4347_v16 = vmul.f32 %v3973_v13, %v4319_v36  ;;  %v3909_v36 = vld [vmem:[%s4143_s21 + $0x98] sm:$0xff]  }
 0x14d   : > { %3651 = vmatprep.subr.bf16.mxu1 %v1332_v10 }
 0x14e   : > { %v1330_v17 = vpack.c.bf16 %v4342_v14, %v4347_v16 }
 0x150   : > { %3652 = vmatpush3.bf16.msra.mxu1 %v1332_v10 }
 0x151   : > { %3653 = vmatprep.subr.bf16.mxu1 %v1331_v15 }
 0x154   : > { %3654 = vmatpush3.bf16.msra.mxu1 %v1331_v15 }
 0x155   : > { %3655 = vmatprep.subr.bf16.mxu1 %v1330_v17 }
 0x158   : > { %3656 = vmatpush3.bf16.msra.mxu1 %v1330_v17 }
 0x15b   : > { %3658 = vmatmul.mubr.msk.bf16.vlgmr.msra.gmra.mxu1 %vm1514_vm3, %v3891_v18 }
 0x15c   : > { %3661 = vmatprep.mubr.msk.bf16.mxu1 %vm1514_vm3, %v3892_v19 }
 0x163   : > { %3662 = vmatmul.mubr.msk.bf16.gmra.mxu1 %vm1514_vm3, %v3893_v20 }
 0x164   : > { %3665 = vmatprep.mubr.msk.bf16.mxu1 %vm1514_vm3, %v3894_v21 }
 0x16b   : > { %3666 = vmatmul.mubr.msk.bf16.gmra.mxu1 %vm1514_vm3, %v3895_v22 }
 0x16c   : > { %3669 = vmatprep.mubr.msk.bf16.mxu1 %vm1514_vm3, %v3896_v23 }
 0x173   : > { %3670 = vmatmul.mubr.msk.bf16.gmra.mxu1 %vm1514_vm3, %v3897_v24 }
 0x174   : > { %3673 = vmatprep.mubr.msk.bf16.mxu1 %vm1514_vm3, %v3898_v25 }
 0x17b   : > { %3674 = vmatmul.mubr.msk.bf16.gmra.mxu1 %vm1514_vm3, %v3899_v26 }
 0x17c   : > { %3677 = vmatprep.mubr.msk.bf16.mxu1 %vm1514_vm3, %v3900_v27 }
 0x183   : > { %3678 = vmatmul.mubr.msk.bf16.gmra.mxu1 %vm1514_vm3, %v3901_v28 }
 0x184   : > { %3681 = vmatprep.mubr.msk.bf16.mxu1 %vm1514_vm3, %v3902_v29 }
 0x18b   : > { %3682 = vmatmul.mubr.msk.bf16.gmra.mxu1 %vm1514_vm3, %v3903_v30 }
 0x18c   : > { %3685 = vmatprep.mubr.msk.bf16.mxu1 %vm1514_vm3, %v3904_v31  ;;  %v4750_v31 = vsub.s32 2, %v4421_v57 }
 0x193   : > { %3686 = vmatmul.mubr.msk.bf16.gmra.mxu1 %vm1514_vm3, %v3905_v32 }
 0x194   : > { %3689 = vmatprep.mubr.msk.bf16.mxu1 %vm1514_vm3, %v3906_v33 }
 0x19b   : > { %3690 = vmatmul.mubr.msk.bf16.gmra.mxu1 %vm1514_vm3, %v3907_v34 }
 0x19c   : > { %3693 = vmatprep.mubr.msk.bf16.mxu1 %vm1514_vm3, %v3908_v35 }
 0x1a3   : > { %3694 = vmatmul.mubr.msk.bf16.gmra.mxu1 %vm1514_vm3, %v3909_v36 }
 0x1a4   : > { %3697 = vmatprep.mubr.msk.bf16.mxu1 %vm1514_vm3, %v3910_v37 }
 0x1ab   : > { %3698 = vmatmul.mubr.msk.bf16.gmra.mxu1 %vm1514_vm3, %v3911_v38 }
 0x1ac   : > { %3701 = vmatprep.mubr.msk.bf16.mxu1 %vm1514_vm3, %v3912_v39 }
 0x1b3   : > { %3702 = vmatmul.mubr.msk.bf16.gmra.mxu1 %vm1514_vm3, %v3913_v40  ;;  %v1979_v40 = vrot.slane %v4428_v62, %v4750_v31 }
 0x1b4   : > { %3705 = vmatprep.mubr.msk.bf16.mxu1 %vm1514_vm3, %v3914_v41 }
 0x1bb   : > { %3706 = vmatmul.mubr.msk.bf16.gmra.mxu1 %vm1514_vm3, %v3915_v42 }
 0x1bc   : > { %3709 = vmatprep.mubr.msk.bf16.mxu1 %vm1514_vm3, %v3916_v43 }
 0x1c3   : > { %3710 = vmatmul.mubr.msk.bf16.gmra.mxu1 %vm1514_vm3, %v3917_v44 }
 0x1c4   : > { %3713 = vmatprep.mubr.msk.bf16.mxu1 %vm1514_vm3, %v3918_v45 }
 0x1cb   : > { %3714 = vmatmul.mubr.msk.bf16.gmra.mxu1 %vm1514_vm3, %v3919_v46 }
 0x1cc   : > { %3717 = vmatprep.mubr.msk.bf16.mxu1 %vm1514_vm3, %v3920_v47 }
 0x1d3   : > { %3718 = vmatmul.mubr.msk.bf16.gmra.mxu1 %vm1514_vm3, %v3921_v48 }
 0x1d4   : > { %3721 = vmatprep.mubr.msk.bf16.mxu1 %vm1514_vm3, %v3922_v49 }
 0x1db   : > { %3722 = vmatmul.mubr.msk.bf16.gmra.mxu1 %vm1514_vm3, %v3923_v50 }
 0x1dc   : > { %3725 = vmatprep.mubr.msk.bf16.mxu1 %vm1514_vm3, %v3924_v51 }
 0x1e3   : > { %3726 = vmatmul.mubr.msk.bf16.gmra.mxu1 %vm1514_vm3, %v3925_v52 }
 0x21b   : > { %v3659_v53 = vpop.f32.mrf.mxu1 }
 0x21c   : > { %v1950_v10 = vmul.f32 %v3659_v53, %v1947_v1 }
 0x21d   : > { %v1657_v55 = vpop.f32.mrf.mxu1 }
 0x21e   : > { %v1948_v15 = vmul.f32 %v1947_v1, %v1657_v55 }
 0x21f   : > { %v3660_v56 = vpop.f32.mrf.mxu1 }
 0x220   : > { %v1951_v20 = vmul.f32 %v3660_v56, %v1947_v1 }
 0x221   : > { %v1660_v58 = vpop.f32.mrf.mxu1 }
 0x222   : > { %v1949_v24 = vmul.f32 %v1947_v1, %v1660_v58 }
 0x223   : > { %v3663_v59 = vpop.f32.mrf.mxu1 }
 0x224   : > { %v1954_v28 = vmul.f32 %v3663_v59, %v1947_v1 }
 0x225   : > { %v1673_v63 = vpop.f32.mrf.mxu1 }
 0x226   : > { %v1952_v33 = vmul.f32 %v1947_v1, %v1673_v63 }
 0x227   : > { %v3664_v0 = vpop.f32.mrf.mxu1 }
 0x228   : > { %v1955_v37 = vmul.f32 %v3664_v0, %v1947_v1  ;;  %v4748_v0 = vsub.s32 3, %v4421_v57 }
 0x229   : > { %v1676_v7 = vpop.f32.mrf.mxu1 }
 0x22a   : > { %v1953_v42 = vmul.f32 %v1947_v1, %v1676_v7 }
 0x22b   : > { %v3667_v8 = vpop.f32.mrf.mxu1 }
 0x22c   : > { %v1962_v11 = vmul.f32 %v3667_v8, %v1959_v4 }
 0x22d   : > { %v1689_v13 = vpop.f32.mrf.mxu1 }
 0x22e   : > { %v1970_v17 = vadd.f32 %v1962_v11, %v1950_v10  ;;  %v1960_v18 = vmul.f32 %v1959_v4, %v1689_v13  ;;  %v1999_v13 = vrot.slane %v4428_v62, %v4748_v0 }
 0x22f   : > { %v3668_v19 = vpop.f32.mrf.mxu1 }
 0x230   : > { %v1968_v21 = vadd.f32 %v1960_v18, %v1948_v15  ;;  %v1963_v22 = vmul.f32 %v3668_v19, %v1959_v4 }
 0x231   : > { %v1692_v23 = vpop.f32.mrf.mxu1 }
 0x232   : > { %v1971_v25 = vadd.f32 %v1963_v22, %v1951_v20  ;;  %v1961_v26 = vmul.f32 %v1959_v4, %v1692_v23 }
 0x233   : > { %v3671_v27 = vpop.f32.mrf.mxu1 }
 0x234   : > { %v1969_v29 = vadd.f32 %v1961_v26, %v1949_v24  ;;  %v1966_v30 = vmul.f32 %v3671_v27, %v1959_v4 }
 0x235   : > { %v1705_v32 = vpop.f32.mrf.mxu1 }
 0x236   : > { %v1974_v34 = vadd.f32 %v1966_v30, %v1954_v28  ;;  %v1964_v35 = vmul.f32 %v1959_v4, %v1705_v32 }
 0x237   : > { %v3672_v36 = vpop.f32.mrf.mxu1 }
 0x238   : > { %v1972_v38 = vadd.f32 %v1964_v35, %v1952_v33  ;;  %v1967_v39 = vmul.f32 %v3672_v36, %v1959_v4  ;;  %v4747_v35 = vsub.s32 4, %v4421_v57 }
 0x239   : > { %v1708_v41 = vpop.f32.mrf.mxu1 }
 0x23a   : > { %v1975_v43 = vadd.f32 %v1967_v39, %v1955_v37  ;;  %v1965_v44 = vmul.f32 %v1959_v4, %v1708_v41 }
 0x23b   : > { %v3675_v45 = vpop.f32.mrf.mxu1 }
 0x23c   : > { %v1973_v46 = vadd.f32 %v1965_v44, %v1953_v42  ;;  %v1982_v47 = vmul.f32 %v3675_v45, %v1979_v40  ;;  %v2019_v42 = vrot.slane %v4428_v62, %v4747_v35 }
 0x23d   : > { %v1721_v48 = vpop.f32.mrf.mxu1 }
 0x23e   : > { %v1990_v49 = vadd.f32 %v1982_v47, %v1970_v17  ;;  %v1980_v50 = vmul.f32 %v1979_v40, %v1721_v48 }
 0x23f   : > { %v3676_v51 = vpop.f32.mrf.mxu1 }
 0x240   : > { %v1988_v52 = vadd.f32 %v1980_v50, %v1968_v21  ;;  %v1983_v53 = vmul.f32 %v3676_v51, %v1979_v40 }
 0x241   : > { %v1724_v54 = vpop.f32.mrf.mxu1 }
 0x242   : > { %v1991_v55 = vadd.f32 %v1983_v53, %v1971_v25  ;;  %v1981_v56 = vmul.f32 %v1979_v40, %v1724_v54  ;;  %v2226_v53 = vld [vmem:[%s4163_s8] sm:$0xf]  ;;  %v4113_v54 = vmov 0.0  }
 0x243   : > { %v3679_v58 = vpop.f32.mrf.mxu1  ;;  %3729 = vmatprep.subr.bf16.mxu0 %v4113_v54  ;;  %3731 = vmatprep.mubr.msk.bf16.mxu0 %vm4114_vm5, %v4113_v54 }
 0x244   : > { %v1989_v59 = vadd.f32 %v1981_v56, %v1969_v29  ;;  %v1986_v63 = vmul.f32 %v3679_v58, %v1979_v40  ;;  %3821 = vmatprep.subr.bf16.mxu1 %v4113_v54  ;;  %3827 = vmatprep.mubr.msk.bf16.mxu1 %vm4114_vm5, %v4113_v54 }
 0x245   : > { %v1737_v1 = vpop.f32.mrf.mxu1 }
 0x246   : > { %v1994_v7 = vadd.f32 %v1986_v63, %v1974_v34  ;;  %v1984_v4 = vmul.f32 %v1979_v40, %v1737_v1 }
 0x247   : > { %v3680_v8 = vpop.f32.mrf.mxu1 }
 0x248   : > { %v1992_v10 = vadd.f32 %v1984_v4, %v1972_v38  ;;  %v1987_v11 = vmul.f32 %v3680_v8, %v1979_v40 }
 0x249   : > { %v1740_v15 = vpop.f32.mrf.mxu1 }
 0x24a   : > { %v1995_v17 = vadd.f32 %v1987_v11, %v1975_v43  ;;  %v1985_v18 = vmul.f32 %v1979_v40, %v1740_v15 }
 0x24b   : > { %v3683_v19 = vpop.f32.mrf.mxu1 }
 0x24c   : > { %v1993_v20 = vadd.f32 %v1985_v18, %v1973_v46  ;;  %v2002_v21 = vmul.f32 %v3683_v19, %v1999_v13 }
 0x24d   : > { %v1753_v22 = vpop.f32.mrf.mxu1 }
 0x24e   : > { %v2010_v23 = vadd.f32 %v2002_v21, %v1990_v49  ;;  %v2000_v24 = vmul.f32 %v1999_v13, %v1753_v22 }
 0x24f   : > { %v3684_v25 = vpop.f32.mrf.mxu1 }
 0x250   : > { %v4443_v26 = vadd.f32 %v2000_v24, %v1988_v52  ;;  %v2003_v27 = vmul.f32 %v3684_v25, %v1999_v13 }
 0x251   : > { %v1756_v28 = vpop.f32.mrf.mxu1 }
 0x252   : > { %v4445_v29 = vadd.f32 %v2003_v27, %v1991_v55  ;;  %v2001_v30 = vmul.f32 %v1999_v13, %v1756_v28  ;;  %v2234_v55 = vsel %vm2232_vm4, %v2226_v53, 0 }
 0x253   : > { %v3687_v32 = vpop.f32.mrf.mxu1  ;;  %3730 = vmatpush3.bf16.msra.mxu0 %v2234_v55 }
 0x254   : > { %v4447_v33 = vadd.f32 %v2001_v30, %v1989_v59  ;;  %v2006_v34 = vmul.f32 %v3687_v32, %v1999_v13  ;;  %3735 = vmatprep.subr.bf16.mxu0 %v4113_v54  ;;  %v4746_v30 = vsub.s32 5, %v4421_v57 }
 0x255   : > { %v1769_v36 = vpop.f32.mrf.mxu1 }
 0x256   : > { %v2014_v37 = vadd.f32 %v2006_v34, %v1994_v7  ;;  %v2004_v38 = vmul.f32 %v1999_v13, %v1769_v36  ;;  %v4749_v34 = vsub.s32 6, %v4421_v57 }
 0x257   : > { %v3688_v39 = vpop.f32.mrf.mxu1 }
 0x258   : > { %v4450_v40 = vadd.f32 %v2004_v38, %v1992_v10  ;;  %v2007_v41 = vmul.f32 %v3688_v39, %v1999_v13  ;;  %v2078_v38 = vsub.s32 7, %v4421_v57 }
 0x259   : > { %v1772_v43 = vpop.f32.mrf.mxu1 }
 0x25a   : > { %v4455_v44 = vadd.f32 %v2007_v41, %v1995_v17  ;;  %v2005_v45 = vmul.f32 %v1999_v13, %v1772_v43 }
 0x25b   : > { %v3691_v46 = vpop.f32.mrf.mxu1 }
 0x25c   : > { %v4457_v47 = vadd.f32 %v2005_v45, %v1993_v20  ;;  %v2022_v48 = vmul.f32 %v3691_v46, %v2019_v42  ;;  %v4487_v45 = vrot.slane %v4428_v62, %v4749_v34 }
 0x25d   : > { %v1785_v49 = vpop.f32.mrf.mxu1 }
 0x25e   : > { %v4459_v50 = vadd.f32 %v2022_v48, %v2010_v23  ;;  %v2020_v41 = vmul.f32 %v2019_v42, %v1785_v49 }
 0x25f   : > { %v3692_v51 = vpop.f32.mrf.mxu1 }
 0x260   : > { %v2023_v43 = vmul.f32 %v3692_v51, %v2019_v42  ;;  %v2028_v49 = vadd.f32 %v2020_v41, %v4443_v26 }
 0x261   : > { %v1788_v52 = vpop.f32.mrf.mxu1 }
 0x262   : > { %v2021_v46 = vmul.f32 %v2019_v42, %v1788_v52  ;;  %v2031_v51 = vadd.f32 %v2023_v43, %v4445_v29 }
 0x263   : > { %v3695_v56 = vpop.f32.mrf.mxu1 }
 0x264   : > { %v2026_v58 = vmul.f32 %v3695_v56, %v2019_v42 }
 0x265   : > { %v1801_v59 = vpop.f32.mrf.mxu1 }
 0x266   : > { %v4470_v63 = vadd.f32 %v2026_v58, %v2014_v37  ;;  %v2039_v37 = vrot.slane %v4428_v62, %v4746_v30  ;;  %v2024_v48 = vmul.f32 %v2019_v42, %v1801_v59  ;;  %v4492_v58 = vrot.slane %v4428_v62, %v2078_v38 }
 0x267   : > { %v3696_v1 = vpop.f32.mrf.mxu1  ;;  %v2029_v59 = vadd.f32 %v2021_v46, %v4447_v33  ;;  %v4507_v33 = vld [vmem:[%s4148_s25 + $0x8] ss:$0 sm:$0xff] }
 0x268   : > { %v2027_v55 = vmul.f32 %v3696_v1, %v2019_v42  ;;  %v2032_v1 = vadd.f32 %v2024_v48, %v4450_v40 }
 0x269   : > { %v1804_v7 = vpop.f32.mrf.mxu1 }
 0x26a   : > { %v2025_v30 = vmul.f32 %v2019_v42, %v1804_v7  ;;  %v2035_v42 = vadd.f32 %v2027_v55, %v4455_v44  ;;  %v4518_v55 = vld [vmem:[%s4153_s29] ss:$0 sm:$0xff] }
 0x26b   : > { %v3699_v4 = vpop.f32.mrf.mxu1 }
 0x26c   : > { %v2042_v56 = vmul.f32 %v3699_v4, %v2039_v37  ;;  %v2033_v29 = vadd.f32 %v2025_v30, %v4457_v47 }
 0x26d   : > { %v1817_v8 = vpop.f32.mrf.mxu1 }
 0x26e   : > { %v2040_v35 = vmul.f32 %v2039_v37, %v1817_v8  ;;  %v2050_v7 = vadd.f32 %v2042_v56, %v4459_v50 }
 0x26f   : > { %v3700_v10 = vpop.f32.mrf.mxu1 }
 0x270   : > { %v2043_v34 = vmul.f32 %v3700_v10, %v2039_v37  ;;  %v2048_v10 = vadd.f32 %v2040_v35, %v2028_v49 }
 0x271   : > { %v1820_v11 = vpop.f32.mrf.mxu1 }
 0x272   : > { %v2041_v4 = vmul.f32 %v2039_v37, %v1820_v11  ;;  %v2051_v40 = vadd.f32 %v2043_v34, %v2031_v51 }
 0x273   : > { %v3703_v13 = vpop.f32.mrf.mxu1 }
 0x274   : > { %v2046_v31 = vmul.f32 %v3703_v13, %v2039_v37  ;;  %v2049_v50 = vadd.f32 %v2041_v4, %v2029_v59 }
 0x275   : > { %v1833_v15 = vpop.f32.mrf.mxu1 }
 0x276   : > { %v2044_v41 = vmul.f32 %v2039_v37, %v1833_v15 }
 0x277   : > { %v3704_v17 = vpop.f32.mrf.mxu1 }
 0x278   : > { %v2052_v34 = vadd.f32 %v2044_v41, %v2032_v1 }
 0x279   : > { %v1836_v18 = vpop.f32.mrf.mxu1 }
 0x27a   : > { %v2045_v46 = vmul.f32 %v2039_v37, %v1836_v18 }
 0x27b   : > { %v3707_v19 = vpop.f32.mrf.mxu1 }
 0x27c   : > { %v2062_v52 = vmul.f32 %v3707_v19, %v4487_v45  ;;  %v2047_v19 = vmul.f32 %v3704_v17, %v2039_v37  ;;  %v2053_v56 = vadd.f32 %v2045_v46, %v2033_v29 }
 0x27d   : > { %v1849_v20 = vpop.f32.mrf.mxu1 }
 0x27e   : > { %v2060_v8 = vmul.f32 %v4487_v45, %v1849_v20  ;;  %v2070_v11 = vadd.f32 %v2062_v52, %v2050_v7  ;;  %v2054_v20 = vadd.f32 %v2046_v31, %v4470_v63  ;;  %v2055_v48 = vadd.f32 %v2047_v19, %v2035_v42  ;;  %v3474_v52 = vld [vmem:[%s4158_s3] ss:$0 sm:$0xff] }
 0x27f   : > { %v3708_v21 = vpop.f32.mrf.mxu1 }
 0x280   : > { %v2063_v13 = vmul.f32 %v3708_v21, %v4487_v45  ;;  %v2068_v35 = vadd.f32 %v2060_v8, %v2048_v10 }
 0x281   : > { %v1852_v22 = vpop.f32.mrf.mxu1 }
 0x282   : > { %v2071_v63 = vadd.f32 %v2063_v13, %v2051_v40 }
 0x283   : > { %v3711_v23 = vpop.f32.mrf.mxu1 }
 0x284   : > { %v2066_v21 = vmul.f32 %v3711_v23, %v4487_v45 }
 0x285   : > { %v4472_v24 = vpop.f32.mrf.mxu1 }
 0x286   : > { %v2074_v42 = vadd.f32 %v2066_v21, %v2054_v20 }
 0x287   : > { %v4474_v25 = vpop.f32.mrf.mxu1 }
 0x288   : > { %v2067_v51 = vmul.f32 %v4474_v25, %v4487_v45 }
 0x289   : > { %v4476_v27 = vpop.f32.mrf.mxu1 }
 0x28a   : > { %v2065_v7 = vmul.f32 %v4487_v45, %v4476_v27  ;;  %v2075_v40 = vadd.f32 %v2067_v51, %v2055_v48 }
 0x28b   : > { %v3715_v28 = vpop.f32.mrf.mxu1 }
 0x28c   : > { %v2082_v26 = vmul.f32 %v3715_v28, %v4492_v58  ;;  %v2061_v28 = vmul.f32 %v4487_v45, %v1852_v22  ;;  %v2073_v20 = vadd.f32 %v2065_v7, %v2053_v56 }
 0x28d   : > { %v1881_v32 = vpop.f32.mrf.mxu1 }
 0x28e   : > { %v2080_v44 = vmul.f32 %v4492_v58, %v1881_v32  ;;  %v2090_v15 = vadd.f32 %v2082_v26, %v2070_v11  ;;  %v2069_v49 = vadd.f32 %v2061_v28, %v2049_v50 }
 0x28f   : > { %v3716_v36 = vpop.f32.mrf.mxu1 }
 0x290   : > { %v2083_v17 = vmul.f32 %v3716_v36, %v4492_v58  ;;  %v2088_v18 = vadd.f32 %v2080_v44, %v2068_v35  ;;  %v2064_v36 = vmul.f32 %v4487_v45, %v4472_v24 }
 0x291   : > { %v1884_v39 = vpop.f32.mrf.mxu1 }
 0x292   : > { %v2081_v32 = vmul.f32 %v4492_v58, %v1884_v39  ;;  %v2091_v59 = vadd.f32 %v2083_v17, %v2071_v63  ;;  %v2072_v19 = vadd.f32 %v2064_v36, %v2052_v34 }
 0x293   : > { %v3719_v53 = vpop.f32.mrf.mxu1 }
 0x294   : > { %v2089_v8 = vadd.f32 %v2081_v32, %v2069_v49  ;;  %v2086_v26 = vmul.f32 %v3719_v53, %v4492_v58 }
 0x295   : > { %v4494_v0 = vpop.f32.mrf.mxu1 }
 0x296   : > { %v2084_v11 = vmul.f32 %v4492_v58, %v4494_v0  ;;  %v2094_v46 = vadd.f32 %v2086_v26, %v2074_v42 }
 0x297   : > { %v3720_v62 = vpop.f32.mrf.mxu1 }
 0x298   : > { %v2087_v13 = vmul.f32 %v3720_v62, %v4492_v58  ;;  %v2092_v17 = vadd.f32 %v2084_v11, %v2072_v19 }
 0x299   : > { %v1900_v43 = vpop.f32.mrf.mxu1 }
 0x29a   : > { %v2085_v28 = vmul.f32 %v4492_v58, %v1900_v43 }
 0x29b   : > { %v3723_v47 = vpop.f32.mrf.mxu1 }
 0x29c   : > { %v2102_v30 = vmul.f32 %v3723_v47, %v4507_v33 }
 0x29d   : > { %v1913_v31 = vpop.f32.mrf.mxu1 }
 0x29e   : > { %v2110_v22 = vadd.f32 %v2102_v30, %v2090_v15  ;;  %v2100_v37 = vmul.f32 %v4507_v33, %v1913_v31  ;;  %v2095_v30 = vadd.f32 %v2087_v13, %v2075_v40  ;;  %v2093_v31 = vadd.f32 %v2085_v28, %v2073_v20 }
 0x29f   : > { %v3724_v23 = vpop.f32.mrf.mxu1 }
 0x2a0   : > { %v2125_v39 = vmul.f32 %v4518_v55, %v2110_v22  ;;  %v2108_v1 = vadd.f32 %v2100_v37, %v2088_v18  ;;  %v2103_v4 = vmul.f32 %v3724_v23, %v4507_v33 }
 0x2a1   : > { %v1916_v29 = vpop.f32.mrf.mxu1 }
 0x2a2   : > { %v4531_v24 = vadd.f32 %v3474_v52, %v2125_v39  ;;  %v2123_v25 = vmul.f32 %v4518_v55, %v2108_v1  ;;  %v2111_v10 = vadd.f32 %v2103_v4, %v2091_v59  ;;  %v2101_v41 = vmul.f32 %v4507_v33, %v1916_v29 }
 0x2a3   : > { %v3727_v44 = vpop.f32.mrf.mxu1 }
 0x2a4   : > { %v3477_v27 = vmul.f32 -1.442695, %v4531_v24  ;;  %v4539_v45 = vadd.f32 %v3474_v52, %v2123_v25  ;;  %v2126_v53 = vmul.f32 %v4518_v55, %v2111_v10  ;;  %v2109_v50 = vadd.f32 %v2101_v41, %v2089_v8 }
 0x2a5   : > { %v2106_v47 = vmul.f32 %v3727_v44, %v4507_v33  ;;  %v1929_v35 = vpop.f32.mrf.mxu1 }
 0x2a6   : > { %3974 = vpow2.f32 %v3477_v27  ;;  %v3475_v0 = vmul.f32 -1.442695, %v4539_v45  ;;  %v4545_v15 = vadd.f32 %v3474_v52, %v2126_v53  ;;  %v2124_v62 = vmul.f32 %v4518_v55, %v2109_v50 }
 0x2a7   : > { %v2114_v34 = vadd.f32 %v2106_v47, %v2094_v46  ;;  %v2104_v48 = vmul.f32 %v4507_v33, %v1929_v35  ;;  %v3728_v21 = vpop.f32.mrf.mxu1 }
 0x2a8   : > { %3976 = vpow2.f32 %v3475_v0  ;;  %v3478_v32 = vmul.f32 -1.442695, %v4545_v15  ;;  %v2139_v58 = vadd.f32 %v3474_v52, %v2124_v62  ;;  %v2107_v43 = vmul.f32 %v3728_v21, %v4507_v33 }
 0x2a9   : > { %v2129_v63 = vmul.f32 %v4518_v55, %v2114_v34  ;;  %v2112_v18 = vadd.f32 %v2104_v48, %v2092_v17  ;;  %v1932_v22 = vpop.f32.mrf.mxu1 }
 0x2aa   : > { %3978 = vpow2.f32 %v3478_v32  ;;  %v3476_v37 = vmul.f32 -1.442695, %v2139_v58  ;;  %v2115_v56 = vadd.f32 %v2107_v43, %v2095_v30  ;;  %v2105_v49 = vmul.f32 %v4507_v33, %v1932_v22 }
 0x2ab   : > { %v2144_v36 = vadd.f32 %v3474_v52, %v2129_v63  ;;  %v2127_v51 = vmul.f32 %v4518_v55, %v2112_v18 }
 0x2ac   : > { %3980 = vpow2.f32 %v3476_v37  ;;  %v2130_v23 = vmul.f32 %v4518_v55, %v2115_v56  ;;  %v2113_v59 = vadd.f32 %v2105_v49, %v2093_v31 }
 0x2ad   : > { %v3481_v39 = vmul.f32 -1.442695, %v2144_v36  ;;  %v2142_v1 = vadd.f32 %v3474_v52, %v2127_v51 }
 0x2ae   : > { %v2145_v4 = vadd.f32 %v3474_v52, %v2130_v23  ;;  %v2128_v42 = vmul.f32 %v4518_v55, %v2113_v59 }
 0x2af   : > { %3982 = vpow2.f32 %v3481_v39  ;;  %v3479_v7 = vmul.f32 -1.442695, %v2142_v1 }
 0x2b0   : > { %v3482_v8 = vmul.f32 -1.442695, %v2145_v4  ;;  %v2143_v26 = vadd.f32 %v3474_v52, %v2128_v42 }
 0x2b1   : > { %3984 = vpow2.f32 %v3479_v7 }
 0x2b2   : > { %3986 = vpow2.f32 %v3482_v8  ;;  %v3480_v29 = vmul.f32 -1.442695, %v2143_v26 }
 0x2b3   : > { %v3975_v33 = vpop.eup %3974 }
 0x2b4   : > { %3988 = vpow2.f32 %v3480_v29  ;;  %v2172_v10 = vadd.f32 1.0, %v3975_v33 }
 0x2b5   : > { %v3977_v25 = vpop.eup %3976 }
 0x2b6   : > { %v2170_v41 = vadd.f32 1.0, %v3977_v25 }
 0x2b7   : > { %v3979_v19 = vpop.eup %3978 }
 0x2b8   : > { %3990 = vrcp.f32 %v2170_v41  ;;  %v2173_v40 = vadd.f32 1.0, %v3979_v19  ;;  %v2283_v19 = vld [vmem:[%s4173_s19] sm:$0x1] }
 0x2b9   : > { %v3981_v11 = vpop.eup %3980  ;;  %3992 = vrcp.f32 %v2172_v10 }
 0x2ba   : > { %v2171_v13 = vadd.f32 1.0, %v3981_v11  ;;  %3994 = vrcp.f32 %v2173_v40  ;;  %v2292_v40 = vsel %vm2290_vm7, %v2283_v19, 0  ;;  %v2228_v11 = vld [vmem:[%s4168_s14] sm:$0x1] }
 0x2bc   : > { %v3983_v55 = vpop.eup %3982  ;;  %3996 = vrcp.f32 %v2171_v13 }
 0x2bd   : > { %v2176_v27 = vadd.f32 1.0, %v3983_v55 }
 0x2be   : > { %v3985_v44 = vpop.eup %3984 }
 0x2bf   : > { %v3987_v52 = vpop.eup %3986  ;;  %v2174_v53 = vadd.f32 1.0, %v3985_v44 }
 0x2c0   : > { %v2177_v50 = vadd.f32 1.0, %v3987_v52 }
 0x2c1   : > { %v3989_v20 = vpop.eup %3988  ;;  %3998 = vrcp.f32 %v2174_v53 }
 0x2c2   : > { %4000 = vrcp.f32 %v2176_v27  ;;  %v2175_v46 = vadd.f32 1.0, %v3989_v20 }
 0x2c3   : > { %4002 = vrcp.f32 %v2177_v50 }
 0x2c4   : > { %4004 = vrcp.f32 %v2175_v46 }
 0x2c5   : > { %v3991_v28 = vpop.eup %3990 }
 0x2c6   : > { %v3993_v47 = vpop.eup %3992  ;;  %v4557_v0 = vmul.f32 %v3991_v28, %v4539_v45 }
 0x2c7   : > { %v3995_v35 = vpop.eup %3994  ;;  %v4560_v17 = vmul.f32 %v3993_v47, %v4531_v24 }
 0x2c8   : > { %v2203_v34 = vsel %vm2202_vm6, %v4557_v0, 0.0  ;;  %v4567_v48 = vmul.f32 %v3995_v35, %v4545_v15  ;;  %v2352_v35 = vld [vmem:[%s4183_s30] sm:$0xf] }
 0x2c9   : > { %v3997_v62 = vpop.eup %3996  ;;  %v2206_v45 = vsel %vm2202_vm6, %v4560_v17, 0.0 }
 0x2ca   : > { %v4562_v30 = vmul.f32 %v3997_v62, %v2139_v58  ;;  %v2208_v18 = vsel %vm2202_vm6, %v4567_v48, 0.0  ;;  %v2370_v62 = vsel %vm2232_vm4, %v2352_v35, 0 }
 0x2cc   : > { %v2204_v21 = vsel %vm2202_vm6, %v4562_v30, 0.0 }
 0x2cd   : > { %v2205_v32 = vadd.f32 %v2204_v21, %v2203_v34  ;;  %v2285_v34 = vld [vmem:[%s4178_s24] sm:$0x1] }
 0x2ce   : > { %v3999_v43 = vpop.eup %3998 }
 0x2cf   : > { %v4001_v31 = vpop.eup %4000  ;;  %v2207_v24 = vadd.f32 %v2206_v45, %v2205_v32  ;;  %v4573_v63 = vmul.f32 %v3999_v43, %v2142_v1 }
 0x2d0   : > { %v4003_v58 = vpop.eup %4002  ;;  %v4577_v15 = vmul.f32 %v4001_v31, %v2144_v36 }
 0x2d1   : > { %v4005_v22 = vpop.eup %4004  ;;  %v2209_v37 = vadd.f32 %v2208_v18, %v2207_v24  ;;  %v2210_v56 = vsel %vm2202_vm6, %v4573_v63, 0.0  ;;  %v4581_v23 = vmul.f32 %v4003_v58, %v2145_v4 }
 0x2d2   : > { %v2199_v49 = vmul.f32 %v4005_v22, %v2143_v26  ;;  %v2214_v1 = vsel %vm2202_vm6, %v4577_v15, 0.0 }
 0x2d3   : > { %v2211_v51 = vadd.f32 %v2210_v56, %v2209_v37  ;;  %v2216_v7 = vsel %vm2202_vm6, %v4581_v23, 0.0 }
 0x2d4   : > { %v2212_v59 = vsel %vm2202_vm6, %v2199_v49, 0.0 }
 0x2d5   : > { %v2213_v39 = vadd.f32 %v2212_v59, %v2211_v51 }
 0x2d7   : > { %v2215_v42 = vadd.f32 %v2214_v1, %v2213_v39 }
 0x2d9   : > { %v2217_v36 = vadd.f32 %v2216_v7, %v2215_v42 }
 0x2db   : > { %v2218_v8 = vrot.slane %v2217_v36, 4 }
 0x2dd   : > { %v2219_v29 = vadd.f32 %v2218_v8, %v2217_v36 }
 0x2df   : > { %v2220_v33 = vrot.slane %v2219_v29, 2 }
 0x2e1   : > { %v2221_v26 = vadd.f32 %v2220_v33, %v2219_v29  ;;  %v3491_v29 = vld [vmem:[%s4768_s18] ss:$0 sm:$0xff]  ;;  %s4785_s18 = sld [smem:[#allocation14_spill]] }
 0x2e3   : > { %v2222_v25 = vrot.slane %v2221_v26, 1 }
 0x2e5   : > { %v2223_v4 = vadd.f32 %v2222_v25, %v2221_v26 }
 0x2e7   : > { %v2225_v10 = vmul.f32 0.015625, %v2223_v4 }
 0x2e9   : > { %v2227_v41 = vpack.c.bf16 %v2225_v10, %v2225_v10 }
 0x2eb   : > { %3732 = vmatmul.mubr.msk.bf16.vlgmr.msra.gmra.mxu0 %vm2202_vm6, %v2227_v41 }
 0x2ec   : > { %3737 = vmatprep.mubr.msk.bf16.mxu0 %vm4114_vm5, %v4113_v54  ;;  %3736 = vmatpush3.bf16.msra.mxu0 %v2292_v40 }
 0x2ed   : > { %3837 = vmatprep.subr.msk.bf16.mxu0 %vm2232_vm4, %v2352_v35 }
 0x3ab   : > { %v2270_v13 = vpop.f32.mrf.mxu0 }
 0x3ac   : > { %v2271_v55 = vadd.f32 %v2270_v13, %v2228_v11 }
 0x3ad   : > { %v3733_v44 = vpop.f32.mrf.mxu0 }
 0x3ae   : > { %v3484_v27 = vmul.f32 -1.442695, %v2271_v55 }
 0x3af   : > { %v2273_v52 = vpop.f32.mrf.mxu0 }
 0x3b0   : > { %4006 = vpow2.f32 %v3484_v27 }
 0x3b1   : > { %v3734_v53 = vpop.f32.mrf.mxu0 }
 0x3bd   : > { %v4007_v50 = vpop.eup %4006 }
 0x3be   : > { %v2279_v20 = vadd.f32 1.0, %v4007_v50 }
 0x3c0   : > { %4008 = vrcp.f32 %v2279_v20 }
 0x3cd   : > { %v4009_v46 = vpop.eup %4008 }
 0x3ce   : > { %v2282_v28 = vmul.f32 %v4009_v46, %v2271_v55 }
 0x3d0   : > { %v2284_v47 = vpack.c.bf16 %v2282_v28, %v2282_v28 }
 0x3d2   : > { %3738 = vmatmul.mubr.msk.bf16.vlgmr.msra.gmra.mxu0 %vm2286_vm8, %v2284_v47 }
 0x3d3   : > { %3742 = vmatpush3.bf16.msra.mxu0 %v2370_v62 }
 0x492   : > { %v2328_v21 = vpop.f32.mrf.mxu0 }
 0x493   : > { %v2329_v32 = vadd.f32 %v2328_v21, %v2285_v34 }
 0x494   : > { %v3739_v43 = vpop.f32.mrf.mxu0 }
 0x495   : > { %v3486_v45 = vmul.f32 -1.442695, %v2329_v32 }
 0x496   : > { %v2331_v31 = vpop.f32.mrf.mxu0 }
 0x497   : > { %4010 = vpow2.f32 %v3486_v45 }
 0x498   : > { %v3740_v24 = vpop.f32.mrf.mxu0 }
 0x4a4   : > { %v4011_v58 = vpop.eup %4010 }
 0x4a5   : > { %v2337_v18 = vadd.f32 1.0, %v4011_v58 }
 0x4a7   : > { %4012 = vrcp.f32 %v2337_v18 }
 0x4b4   : > { %v4013_v22 = vpop.eup %4012 }
 0x4b5   : > { %v2343_v37 = vrot.slane %v4013_v22, %v4424_v60 }
 0x4b7   : > { %v2344_v56 = vmul.f32 %v2343_v37, %v4557_v0  ;;  %v2345_v51 = vmul.f32 %v2343_v37, %v4562_v30  ;;  %v2346_v59 = vmul.f32 %v2343_v37, %v4560_v17  ;;  %v2347_v39 = vmul.f32 %v2343_v37, %v4567_v48  ;;  %v2475_v48 = vld [vmem:[%s4198_s20] sm:$0xf] }
 0x4b8   : > { %v2348_v1 = vmul.f32 %v2343_v37, %v4573_v63  ;;  %v2349_v42 = vmul.f32 %v2343_v37, %v2199_v49  ;;  %v2350_v0 = vmul.f32 %v2343_v37, %v4577_v15  ;;  %v2351_v17 = vmul.f32 %v2343_v37, %v4581_v23  ;;  %3838 = vmatprep.subr.msk.bf16.mxu0 %vm2232_vm4, %v2475_v48  ;;  %v3492_v15 = vld [vmem:[%s4769_s22] ss:$0 sm:$0xff]  ;;  %s4786_s22 = sld [smem:[#allocation18_spill]] }
 0x4b9   : > { %v2353_v7 = vpack.c.bf16 %v2345_v51, %v2344_v56  ;;  %v2354_v36 = vpack.c.bf16 %v2347_v39, %v2346_v59  ;;  %v2493_v63 = vsel %vm2232_vm4, %v2475_v48, 0 }
 0x4ba   : > { %v2355_v8 = vpack.c.bf16 %v2349_v42, %v2348_v1  ;;  %v2356_v30 = vpack.c.bf16 %v2351_v17, %v2350_v0 }
 0x4bb   : > { %3743 = vmatprep.mubr.msk.bf16.mxu0 %vm2202_vm6, %v2353_v7 }
 0x4bc   : > { %3744 = vmatmul.mubr.msk.bf16.vlgmr.msra.gmra.mxu0 %vm2202_vm6, %v2354_v36 }
 0x4bd   : > { %3747 = vmatprep.mubr.msk.bf16.mxu0 %vm2202_vm6, %v2355_v8  ;;  %3752 = vmatpush3.bf16.msra.mxu0 %v2493_v63 }
 0x4be   : > { %3761 = vmatprep.subr.bf16.mxu0 %v4113_v54 }
 0x4c4   : > { %3748 = vmatmul.mubr.msk.bf16.gmra.mxu0 %vm2202_vm6, %v2356_v30 }
 0x57c   : > { %v3745_v49 = vpop.f32.mrf.mxu0 }
 0x57d   : > { %v2446_v25 = vmul.f32 %v3745_v49, %v3491_v29 }
 0x57e   : > { %v2406_v33 = vpop.f32.mrf.mxu0 }
 0x57f   : > { %v2444_v26 = vmul.f32 %v3491_v29, %v2406_v33  ;;  %v2461_v11 = vadd.f32 %v3492_v15, %v2446_v25 }
 0x580   : > { %v3746_v4 = vpop.f32.mrf.mxu0 }
 0x581   : > { %v2447_v10 = vmul.f32 %v3746_v4, %v3491_v29  ;;  %v2459_v41 = vadd.f32 %v3492_v15, %v2444_v26  ;;  %v2469_v20 = vadd.f32 %v2461_v11, %v4339_v12 }
 0x582   : > { %v2409_v23 = vpop.f32.mrf.mxu0 }
 0x583   : > { %v2462_v19 = vadd.f32 %v3492_v15, %v2447_v10  ;;  %v2445_v40 = vmul.f32 %v3491_v29, %v2409_v23  ;;  %v2467_v52 = vadd.f32 %v2459_v41, %v4347_v16 }
 0x584   : > { %v3749_v13 = vpop.f32.mrf.mxu0 }
 0x585   : > { %v2460_v55 = vadd.f32 %v3492_v15, %v2445_v40  ;;  %v2470_v44 = vadd.f32 %v2462_v19, %v4334_v9  ;;  %v2450_v46 = vmul.f32 %v3749_v13, %v3491_v29 }
 0x586   : > { %v2422_v27 = vpop.f32.mrf.mxu0 }
 0x587   : > { %v2468_v53 = vadd.f32 %v2460_v55, %v4342_v14  ;;  %v2448_v50 = vmul.f32 %v3491_v29, %v2422_v27  ;;  %v2477_v62 = vpack.c.bf16 %v2470_v44, %v2469_v20  ;;  %v2465_v9 = vadd.f32 %v3492_v15, %v2450_v46 }
 0x588   : > { %v3750_v28 = vpop.f32.mrf.mxu0 }
 0x589   : > { %v2476_v47 = vpack.c.bf16 %v2468_v53, %v2467_v52  ;;  %v2451_v35 = vmul.f32 %v3750_v28, %v3491_v29  ;;  %v2463_v21 = vadd.f32 %v3492_v15, %v2448_v50  ;;  %v2473_v31 = vadd.f32 %v2465_v9, %v4323_v2 }
 0x58a   : > { %v2425_v34 = vpop.f32.mrf.mxu0 }
 0x58b   : > { %v2466_v32 = vadd.f32 %v3492_v15, %v2451_v35  ;;  %v2449_v43 = vmul.f32 %v3491_v29, %v2425_v34  ;;  %3753 = vmatprep.mubr.msk.bf16.mxu0 %vm2202_vm6, %v2476_v47  ;;  %v2471_v12 = vadd.f32 %v2463_v21, %v4327_v5 }
 0x58c   : > { %3754 = vmatmul.mubr.msk.bf16.vlgmr.msra.gmra.mxu0 %vm2202_vm6, %v2477_v62 }
 0x58d   : > { %v2464_v16 = vadd.f32 %v3492_v15, %v2449_v43  ;;  %v2474_v14 = vadd.f32 %v2466_v32, %v4325_v3  ;;  %v3497_v3 = vld [vmem:[%s4770_s23] ss:$0 sm:$0xff]  ;;  %s4787_s23 = sld [smem:[#allocation16_spill]] }
 0x58f   : > { %v2472_v45 = vadd.f32 %v2464_v16, %v4329_v6  ;;  %v2479_v58 = vpack.c.bf16 %v2474_v14, %v2473_v31  ;;  %v3498_v6 = vld [vmem:[%s4771_s26] ss:$0 sm:$0xff]  ;;  %s4788_s26 = sld [smem:[#allocation17_spill]] }
 0x591   : > { %v2478_v24 = vpack.c.bf16 %v2472_v45, %v2471_v12 }
 0x593   : > { %3757 = vmatprep.mubr.msk.bf16.mxu0 %vm2202_vm6, %v2478_v24 }
 0x594   : > { %3758 = vmatmul.mubr.msk.bf16.gmra.mxu0 %vm2202_vm6, %v2479_v58 }
 0x595   : > { %3769 = vmatprep.mubr.msk.bf16.mxu0 %vm4114_vm5, %v4113_v54 }
 0x64c   : > { %v3755_v18 = vpop.f32.mrf.mxu0 }
 0x64d   : > { %v2569_v51 = vmul.f32 %v3755_v18, %v3497_v3 }
 0x64e   : > { %v2529_v22 = vpop.f32.mrf.mxu0 }
 0x64f   : > { %v4635_v8 = vadd.f32 %v3498_v6, %v2569_v51  ;;  %v2567_v17 = vmul.f32 %v3497_v3, %v2529_v22 }
 0x650   : > { %v3756_v37 = vpop.f32.mrf.mxu0 }
 0x651   : > { %v2570_v56 = vmul.f32 %v3756_v37, %v3497_v3  ;;  %v3501_v15 = vmul.f32 -1.442695, %v4635_v8  ;;  %v2582_v10 = vadd.f32 %v3498_v6, %v2567_v17  ;;  %v3932_v17 = vld [vmem:[%s4772_s28 + $0x30] sm:$0xff]  }
 0x652   : > { %v2532_v5 = vpop.f32.mrf.mxu0 }
 0x653   : > { %v4633_v2 = vadd.f32 %v3498_v6, %v2570_v56  ;;  %v2568_v1 = vmul.f32 %v3497_v3, %v2532_v5  ;;  %v3499_v11 = vmul.f32 -1.442695, %v2582_v10 }
 0x654   : > { %v3759_v59 = vpop.f32.mrf.mxu0 }
 0x655   : > { %v2573_v39 = vmul.f32 %v3759_v59, %v3497_v3  ;;  %v3502_v49 = vmul.f32 -1.442695, %v4633_v2  ;;  %v4638_v29 = vadd.f32 %v3498_v6, %v2568_v1  ;;  %v3926_v1 = vld [vmem:[%s4772_s28] sm:$0xff]  }
 0x656   : > { %v2545_v42 = vpop.f32.mrf.mxu0 }
 0x657   : > { %v2588_v7 = vadd.f32 %v3498_v6, %v2573_v39  ;;  %v2571_v36 = vmul.f32 %v3497_v3, %v2545_v42  ;;  %v3500_v19 = vmul.f32 -1.442695, %v4638_v29  ;;  %v3927_v42 = vld [vmem:[%s4772_s28 + $0x8] sm:$0xff]  }
 0x658   : > { %v3760_v0 = vpop.f32.mrf.mxu0 }
 0x659   : > { %v3505_v30 = vmul.f32 -1.442695, %v2588_v7  ;;  %v2586_v48 = vadd.f32 %v3498_v6, %v2571_v36  ;;  %v2574_v63 = vmul.f32 %v3760_v0, %v3497_v3  ;;  %v3929_v36 = vld [vmem:[%s4772_s28 + $0x18] sm:$0xff]   ;;  %v3931_v0 = vld [vmem:[%s4772_s28 + $0x28] sm:$0xff]  }
 0x65a   : > { %v2548_v33 = vpop.f32.mrf.mxu0 }
 0x65b   : > { %4014 = vpow2.f32 %v3505_v30  ;;  %v3503_v26 = vmul.f32 -1.442695, %v2586_v48  ;;  %v2589_v25 = vadd.f32 %v3498_v6, %v2574_v63  ;;  %v2572_v4 = vmul.f32 %v3497_v3, %v2548_v33  ;;  %v3933_v30 = vld [vmem:[%s4772_s28 + $0x38] sm:$0xff]   ;;  %v3935_v63 = vld [vmem:[%s4773_s1 + $0x10] sm:$0xff]  }
 0x65d   : > { %4016 = vpow2.f32 %v3503_v26  ;;  %v3506_v23 = vmul.f32 -1.442695, %v2589_v25  ;;  %v2587_v41 = vadd.f32 %v3498_v6, %v2572_v4 }
 0x65e   : > { %4018 = vpow2.f32 %v3502_v49  ;;  %v3936_v49 = vld [vmem:[%s4773_s1 + $0x8] sm:$0xff]  }
 0x65f   : > { %4020 = vpow2.f32 %v3506_v23  ;;  %v3504_v40 = vmul.f32 -1.442695, %v2587_v41 }
 0x660   : > { %4022 = vpow2.f32 %v3501_v15 }
 0x661   : > { %4024 = vpow2.f32 %v3504_v40 }
 0x662   : > { %4026 = vpow2.f32 %v3500_v19 }
 0x663   : > { %4028 = vpow2.f32 %v3499_v11 }
 0x668   : > { %v4015_v13 = vpop.eup %4014 }
 0x669   : > { %v2620_v55 = vadd.f32 1.0, %v4015_v13 }
 0x66a   : > { %v4017_v44 = vpop.eup %4016 }
 0x66b   : > { %v4019_v27 = vpop.eup %4018  ;;  %v2618_v53 = vadd.f32 1.0, %v4017_v44  ;;  %4030 = vrcp.f32 %v2620_v55 }
 0x66c   : > { %v4021_v52 = vpop.eup %4020  ;;  %v2617_v28 = vadd.f32 1.0, %v4019_v27 }
 0x66d   : > { %v4023_v50 = vpop.eup %4022  ;;  %v2621_v20 = vadd.f32 1.0, %v4021_v52 }
 0x66e   : > { %v4025_v46 = vpop.eup %4024  ;;  %v2616_v62 = vadd.f32 1.0, %v4023_v50 }
 0x66f   : > { %4032 = vrcp.f32 %v2621_v20  ;;  %v2619_v47 = vadd.f32 1.0, %v4025_v46  ;;  %v4027_v35 = vpop.eup %4026 }
 0x670   : > { %4034 = vrcp.f32 %v2618_v53  ;;  %v4029_v34 = vpop.eup %4028  ;;  %v2615_v21 = vadd.f32 1.0, %v4027_v35  ;;  %v2664_v35 = vld [vmem:[%s4774_s2] sm:$0xff] }
 0x671   : > { %4036 = vrcp.f32 %v2619_v47  ;;  %v2614_v32 = vadd.f32 1.0, %v4029_v34  ;;  %v2856_v34 = vrot.slane %v2664_v35, %v1958_v61 }
 0x672   : > { %4038 = vrcp.f32 %v2617_v28 }
 0x673   : > { %4040 = vrcp.f32 %v2616_v62 }
 0x674   : > { %4042 = vrcp.f32 %v2615_v21 }
 0x675   : > { %4044 = vrcp.f32 %v2614_v32  ;;  %v2850_v32 = vrot.slane %v2664_v35, %v4424_v60 }
 0x678   : > { %v4031_v43 = vpop.eup %4030 }
 0x679   : > { %v2644_v14 = vmul.f32 %v4031_v43, %v2588_v7  ;;  %v3928_v7 = vld [vmem:[%s4772_s28 + $0x10] sm:$0xff]   ;;  %v4775_v43 = vsub.s32 2, %v4421_v57 }
 0x67c   : > { %v4033_v9 = vpop.eup %4032 }
 0x67d   : > { %v4035_v16 = vpop.eup %4034  ;;  %v2645_v12 = vmul.f32 %v4033_v9, %v2589_v25  ;;  %v2864_v9 = vrot.slane %v2664_v35, %v4775_v43 }
 0x67e   : > { %v4037_v45 = vpop.eup %4036  ;;  %v2642_v18 = vmul.f32 %v4035_v16, %v2586_v48  ;;  %v3934_v48 = vld [vmem:[%s4772_s28 + $0x40] sm:$0xff]  }
 0x67f   : > { %v2669_v31 = vpack.c.bf16 %v2645_v12, %v2644_v14  ;;  %v2643_v24 = vmul.f32 %v4037_v45, %v2587_v41  ;;  %v4039_v58 = vpop.eup %4038  ;;  %v4776_v12 = vsub.s32 3, %v4421_v57 }
 0x680   : > { %v4041_v22 = vpop.eup %4040  ;;  %v2641_v37 = vmul.f32 %v4039_v58, %v4633_v2 }
 0x681   : > { %3762 = vmatpush3.bf16.msra.mxu0 %v2669_v31  ;;  %v2668_v3 = vpack.c.bf16 %v2643_v24, %v2642_v18  ;;  %v4043_v56 = vpop.eup %4042  ;;  %v2640_v5 = vmul.f32 %v4041_v22, %v4635_v8  ;;  %v3930_v8 = vld [vmem:[%s4772_s28 + $0x20] sm:$0xff]   ;;  %v2872_v45 = vrot.slane %v2664_v35, %v4776_v12  ;;  %v4777_v18 = vsub.s32 4, %v4421_v57 }
 0x682   : > { %3763 = vmatprep.subr.bf16.mxu0 %v4113_v54  ;;  %v4045_v51 = vpop.eup %4044  ;;  %v2639_v6 = vmul.f32 %v4043_v56, %v4638_v29  ;;  %v3937_v29 = vld [vmem:[%s4773_s1] sm:$0xff]  }
 0x683   : > { %v2667_v59 = vpack.c.bf16 %v2641_v37, %v2640_v5  ;;  %v2638_v39 = vmul.f32 %v4045_v51, %v2582_v10  ;;  %v2880_v22 = vrot.slane %v2664_v35, %v4777_v18  ;;  %v4778_v5 = vsub.s32 5, %v4421_v57 }
 0x685   : > { %3764 = vmatpush3.bf16.msra.mxu0 %v2668_v3  ;;  %v2666_v2 = vpack.c.bf16 %v2639_v6, %v2638_v39  ;;  %v2888_v51 = vrot.slane %v2664_v35, %v4778_v5 }
 0x686   : > { %3765 = vmatprep.subr.bf16.mxu0 %v4113_v54 }
 0x689   : > { %3766 = vmatpush3.bf16.msra.mxu0 %v2667_v59  ;;  %v4779_v59 = vsub.s32 6, %v4421_v57  ;;  %v3525_v57 = vld [vmem:[%s4774_s2 + $0x8] ss:$0 sm:$0xff] }
 0x68a   : > { %3767 = vmatprep.subr.bf16.mxu0 %v4113_v54 }
 0x68b   : > { %v2896_v6 = vrot.slane %v2664_v35, %v4779_v59 }
 0x68d   : > { %3768 = vmatpush3.bf16.msra.mxu0 %v2666_v2 }
 0x68e   : > { %3805 = vmatprep.subr.bf16.mxu0 %v4113_v54 }
 0x690   : > { %3770 = vmatmul.mubr.msk.bf16.vlgmr.msra.gmra.mxu0 %vm1514_vm3, %v3926_v1 }
 0x691   : > { %3773 = vmatprep.mubr.msk.bf16.mxu0 %vm4114_vm5, %v4113_v54  ;;  %3806 = vmatpush3.bf16.msra.mxu0 %v3935_v63 }
 0x692   : > { %3807 = vmatprep.subr.bf16.mxu0 %v4113_v54 }
 0x695   : > { %3808 = vmatpush3.bf16.msra.mxu0 %v3936_v49 }
 0x696   : > { %3809 = vmatprep.subr.bf16.mxu0 %v4113_v54 }
 0x698   : > { %3774 = vmatmul.mubr.msk.bf16.gmra.mxu0 %vm1514_vm3, %v3927_v42 }
 0x699   : > { %3777 = vmatprep.mubr.msk.bf16.mxu0 %vm4114_vm5, %v4113_v54  ;;  %3810 = vmatpush3.bf16.msra.mxu0 %v3937_v29 }
 0x69a   : > { %3815 = vmatprep.subr.bf16.mxu0 %v4113_v54 }
 0x6a0   : > { %3778 = vmatmul.mubr.msk.bf16.gmra.mxu0 %vm1514_vm3, %v3928_v7 }
 0x6a1   : > { %3781 = vmatprep.mubr.msk.bf16.mxu0 %vm4114_vm5, %v4113_v54 }
 0x6a8   : > { %3782 = vmatmul.mubr.msk.bf16.gmra.mxu0 %vm1514_vm3, %v3929_v36 }
 0x6a9   : > { %3785 = vmatprep.mubr.msk.bf16.mxu0 %vm4114_vm5, %v4113_v54 }
 0x6b0   : > { %3786 = vmatmul.mubr.msk.bf16.gmra.mxu0 %vm1514_vm3, %v3930_v8  ;;  %v2904_v8 = vrot.slane %v2664_v35, %v2078_v38 }
 0x6b1   : > { %3789 = vmatprep.mubr.msk.bf16.mxu0 %vm4114_vm5, %v4113_v54 }
 0x6b8   : > { %3790 = vmatmul.mubr.msk.bf16.gmra.mxu0 %vm1514_vm3, %v3931_v0 }
 0x6b9   : > { %3793 = vmatprep.mubr.msk.bf16.mxu0 %vm4114_vm5, %v4113_v54 }
 0x6c0   : > { %3794 = vmatmul.mubr.msk.bf16.gmra.mxu0 %vm1514_vm3, %v3932_v17 }
 0x6c1   : > { %3797 = vmatprep.mubr.msk.bf16.mxu0 %vm4114_vm5, %v4113_v54 }
 0x6c8   : > { %3798 = vmatmul.mubr.msk.bf16.gmra.mxu0 %vm1514_vm3, %v3933_v30 }
 0x6c9   : > { %3801 = vmatprep.mubr.msk.bf16.mxu0 %vm4114_vm5, %v4113_v54 }
 0x6d0   : > { %3802 = vmatmul.mubr.msk.bf16.gmra.mxu0 %vm1514_vm3, %v3934_v48 }
 0x6d1   : > { %3811 = vmatprep.mubr.msk.bf16.mxu0 %vm4114_vm5, %v4113_v54 }
 0x750   : > { %v2776_v33 = vpop.f32.mrf.mxu0 }
 0x751   : > { %v2851_v24 = vmul.f32 %v2850_v32, %v2776_v33 }
 0x752   : > { %v3771_v26 = vpop.f32.mrf.mxu0 }
 0x754   : > { %v2779_v25 = vpop.f32.mrf.mxu0 }
 0x755   : > { %v2852_v2 = vmul.f32 %v2850_v32, %v2779_v25 }
 0x756   : > { %v3772_v4 = vpop.f32.mrf.mxu0 }
 0x758   : > { %v2784_v15 = vpop.f32.mrf.mxu0 }
 0x759   : > { %v2857_v14 = vmul.f32 %v2856_v34, %v2784_v15 }
 0x75a   : > { %v3775_v10 = vpop.f32.mrf.mxu0 }
 0x75b   : > { %v2859_v3 = vadd.f32 %v2857_v14, %v2851_v24 }
 0x75c   : > { %v2787_v23 = vpop.f32.mrf.mxu0 }
 0x75d   : > { %v2858_v61 = vmul.f32 %v2856_v34, %v2787_v23 }
 0x75e   : > { %v3776_v41 = vpop.f32.mrf.mxu0 }
 0x75f   : > { %v2860_v0 = vadd.f32 %v2858_v61, %v2852_v2 }
 0x760   : > { %v2792_v19 = vpop.f32.mrf.mxu0 }
 0x761   : > { %v2865_v58 = vmul.f32 %v2864_v9, %v2792_v19 }
 0x762   : > { %v3779_v40 = vpop.f32.mrf.mxu0 }
 0x763   : > { %v2867_v1 = vadd.f32 %v2865_v58, %v2859_v3 }
 0x764   : > { %v2795_v11 = vpop.f32.mrf.mxu0 }
 0x765   : > { %v2866_v42 = vmul.f32 %v2864_v9, %v2795_v11 }
 0x766   : > { %v3780_v13 = vpop.f32.mrf.mxu0 }
 0x767   : > { %v2868_v49 = vadd.f32 %v2866_v42, %v2860_v0  ;;  %v3939_v0 = vld [vmem:[%s4783_s0 + $0x8] sm:$0xff]  }
 0x768   : > { %v2800_v55 = vpop.f32.mrf.mxu0 }
 0x769   : > { %v2873_v56 = vmul.f32 %v2872_v45, %v2800_v55 }
 0x76a   : > { %v3783_v44 = vpop.f32.mrf.mxu0 }
 0x76b   : > { %v2875_v17 = vadd.f32 %v2873_v56, %v2867_v1 }
 0x76c   : > { %v2803_v27 = vpop.f32.mrf.mxu0 }
 0x76d   : > { %v2874_v30 = vmul.f32 %v2872_v45, %v2803_v27 }
 0x76e   : > { %v3784_v52 = vpop.f32.mrf.mxu0 }
 0x76f   : > { %v2876_v25 = vadd.f32 %v2874_v30, %v2868_v49  ;;  %v3526_v52 = vld [vmem:[%s4780_s10] ss:$0 sm:$0xff]  ;;  %s4789_s10 = sld [smem:[#allocation19_spill]] }
 0x770   : > { %v2808_v53 = vpop.f32.mrf.mxu0  ;;  %v2968_v30 = vld [vmem:[%s4784_s4] sm:$0x1] }
 0x771   : > { %v2881_v7 = vmul.f32 %v2880_v22, %v2808_v53 }
 0x772   : > { %v3787_v50 = vpop.f32.mrf.mxu0 }
 0x773   : > { %v2883_v29 = vadd.f32 %v2881_v7, %v2875_v17  ;;  %v3037_v7 = vld [vmem:[%s4782_s11] sm:$0x1] }
 0x774   : > { %v2811_v20 = vpop.f32.mrf.mxu0  ;;  %v3940_v17 = vld [vmem:[%s4783_s0] sm:$0xff]  }
 0x775   : > { %v2882_v33 = vmul.f32 %v2880_v22, %v2811_v20 }
 0x776   : > { %v3788_v46 = vpop.f32.mrf.mxu0 }
 0x777   : > { %v2884_v38 = vadd.f32 %v2882_v33, %v2876_v25  ;;  %v3527_v46 = vld [vmem:[%s4781_s7] ss:$0 sm:$0xff]  ;;  %s1040_s7 = scalar_lea.vmem %s4291_s12, %s4791_s16 }
 0x778   : > { %v2816_v28 = vpop.f32.mrf.mxu0 }
 0x779   : > { %v2889_v48 = vmul.f32 %v2888_v51, %v2816_v28 }
 0x77a   : > { %v3791_v47 = vpop.f32.mrf.mxu0 }
 0x77b   : > { %v2891_v15 = vadd.f32 %v2889_v48, %v2883_v29 }
 0x77c   : > { %v2819_v62 = vpop.f32.mrf.mxu0 }
 0x77d   : > { %v2890_v10 = vmul.f32 %v2888_v51, %v2819_v62 }
 0x77e   : > { %v3792_v21 = vpop.f32.mrf.mxu0 }
 0x77f   : > { %v2892_v13 = vadd.f32 %v2890_v10, %v2884_v38 }
 0x780   : > { %v2824_v16 = vpop.f32.mrf.mxu0 }
 0x781   : > { %v2897_v26 = vmul.f32 %v2896_v6, %v2824_v16 }
 0x782   : > { %v3795_v31 = vpop.f32.mrf.mxu0 }
 0x783   : > { %v2899_v19 = vadd.f32 %v2897_v26, %v2891_v15 }
 0x784   : > { %v2827_v37 = vpop.f32.mrf.mxu0 }
 0x785   : > { %v2898_v40 = vmul.f32 %v2896_v6, %v2827_v37 }
 0x786   : > { %v3796_v39 = vpop.f32.mrf.mxu0 }
 0x787   : > { %v2900_v50 = vadd.f32 %v2898_v40, %v2892_v13 }
 0x788   : > { %v2832_v36 = vpop.f32.mrf.mxu0 }
 0x789   : > { %v2905_v23 = vmul.f32 %v2904_v8, %v2832_v36  ;;  %v3044_v36 = vsel %vm2290_vm7, %v3037_v7, 0 }
 0x78a   : > { %v3799_v63 = vpop.f32.mrf.mxu0 }
 0x78b   : > { %v2907_v55 = vadd.f32 %v2905_v23, %v2899_v19 }
 0x78c   : > { %v2835_v4 = vpop.f32.mrf.mxu0 }
 0x78d   : > { %v2906_v44 = vmul.f32 %v2904_v8, %v2835_v4  ;;  %v3938_v8 = vld [vmem:[%s4783_s0 + $0x10] sm:$0xff]  }
 0x78e   : > { %v3800_v41 = vpop.f32.mrf.mxu0  ;;  %3822 = vmatpush3.bf16.msra.mxu1 %v3938_v8 }
 0x78f   : > { %v2908_v47 = vadd.f32 %v2906_v44, %v2900_v50  ;;  %3823 = vmatprep.subr.bf16.mxu1 %v4113_v54  ;;  %v3039_v41 = vld [vmem:[%s4785_s18] sm:$0x1] }
 0x790   : > { %v2840_v11 = vpop.f32.mrf.mxu0 }
 0x791   : > { %v2913_v27 = vmul.f32 %v3525_v57, %v2840_v11 }
 0x792   : > { %v3803_v53 = vpop.f32.mrf.mxu0  ;;  %3824 = vmatpush3.bf16.msra.mxu1 %v3939_v0 }
 0x793   : > { %v2915_v20 = vadd.f32 %v2913_v27, %v2907_v55  ;;  %3825 = vmatprep.subr.bf16.mxu1 %v4113_v54 }
 0x794   : > { %v2843_v28 = vpop.f32.mrf.mxu0 }
 0x795   : > { %v2924_v35 = vmul.f32 %v3526_v52, %v2915_v20  ;;  %v2914_v62 = vmul.f32 %v3525_v57, %v2843_v28  ;;  %v3941_v20 = vld [vmem:[%s4786_s22] sm:$0xff]  }
 0x796   : > { %v3804_v34 = vpop.f32.mrf.mxu0  ;;  %3826 = vmatpush3.bf16.msra.mxu1 %v3940_v17  ;;  %v3541_v28 = vld [vmem:[%s4787_s23] ss:$0 sm:$0xff] }
 0x797   : > { %v2933_v21 = vadd.f32 %v3527_v46, %v2924_v35  ;;  %v2916_v32 = vadd.f32 %v2914_v62, %v2908_v47  ;;  %v3542_v62 = vld [vmem:[%s4788_s26] ss:$0 sm:$0xff] }
 0x799   : > { %v3528_v43 = vmul.f32 -1.442695, %v2933_v21  ;;  %v2925_v9 = vmul.f32 %v3526_v52, %v2916_v32 }
 0x79b   : > { %4046 = vpow2.f32 %v3528_v43  ;;  %v2934_v16 = vadd.f32 %v3527_v46, %v2925_v9 }
 0x79d   : > { %v3529_v14 = vmul.f32 -1.442695, %v2934_v16 }
 0x79f   : > { %4048 = vpow2.f32 %v3529_v14 }
 0x7a8   : > { %v4047_v12 = vpop.eup %4046 }
 0x7a9   : > { %v2941_v45 = vadd.f32 1.0, %v4047_v12  ;;  %v3546_v12 = vld [vmem:[%s4278_s6] ss:$0 sm:$0xff] }
 0x7ab   : > { %4050 = vrcp.f32 %v2941_v45 }
 0x7ac   : > { %v4049_v31 = vpop.eup %4048 }
 0x7ad   : > { %v2942_v24 = vadd.f32 1.0, %v4049_v31 }
 0x7af   : > { %4052 = vrcp.f32 %v2942_v24 }
 0x7b8   : > { %v4051_v58 = vpop.eup %4050 }
 0x7b9   : > { %v2947_v18 = vmul.f32 %v4051_v58, %v2933_v21 }
 0x7bb   : > { %v2950_v3 = vsel %vm2949_vm9, %v2947_v18, 0.0 }
 0x7bc   : > { %v4053_v22 = vpop.eup %4052 }
 0x7bd   : > { %v2948_v37 = vmul.f32 %v4053_v22, %v2934_v16  ;;  %v3545_v16 = vld [vmem:[%s4789_s10] ss:$0 sm:$0xff] }
 0x7bf   : > { %v2951_v61 = vsel %vm2949_vm9, %v2948_v37, 0.0 }
 0x7c0   : > { %v2952_v56 = vadd.f32 %v2951_v61, %v2950_v3 }
 0x7c2   : > { %v2953_v5 = vrot.slane %v2952_v56, 4 }
 0x7c4   : > { %v2954_v51 = vadd.f32 %v2953_v5, %v2952_v56 }
 0x7c6   : > { %v2955_v59 = vrot.slane %v2954_v51, 2 }
 0x7c8   : > { %v2956_v6 = vadd.f32 %v2955_v59, %v2954_v51 }
 0x7ca   : > { %v2957_v39 = vrot.slane %v2956_v6, 1 }
 0x7cc   : > { %v2958_v2 = vadd.f32 %v2957_v39, %v2956_v6 }
 0x7ce   : > { %v2960_v1 = vmul.f32 0.0625, %v2958_v2 }
 0x7d0   : > { %v2967_v42 = vpack.c.bf16 %v2960_v1, %v2960_v1 }
 0x7d2   : > { %3812 = vmatmul.mubr.msk.bf16.vlgmr.msra.gmra.mxu0 %vm2949_vm9, %v2967_v42 }
 0x7d3   : > { %3817 = vmatprep.mubr.msk.bf16.mxu0 %vm4114_vm5, %v4113_v54  ;;  %3816 = vmatpush3.bf16.msra.mxu0 %v3044_v36 }
 0x7d4   : > { %3831 = vmatprep.subr.bf16.mxu0 %v4113_v54 }
 0x892   : > { %v3024_v48 = vpop.f32.mrf.mxu0 }
 0x893   : > { %v3025_v63 = vadd.f32 %v3024_v48, %v2968_v30 }
 0x894   : > { %v3813_v49 = vpop.f32.mrf.mxu0 }
 0x895   : > { %v3534_v29 = vmul.f32 -1.442695, %v3025_v63  ;;  %v3282_v49 = vld [vmem:[%s4283_s27] sm:$0x1] }
 0x896   : > { %v3027_v33 = vpop.f32.mrf.mxu0 }
 0x897   : > { %4054 = vpow2.f32 %v3534_v29 }
 0x898   : > { %v3814_v26 = vpop.f32.mrf.mxu0 }
 0x8a4   : > { %v4055_v4 = vpop.eup %4054 }
 0x8a5   : > { %v3033_v25 = vadd.f32 1.0, %v4055_v4  ;;  %v3288_v4 = vld [vmem:[#allocation2] sm:$0x1] }
 0x8a7   : > { %4056 = vrcp.f32 %v3033_v25 }
 0x8b4   : > { %v4057_v15 = vpop.eup %4056 }
 0x8b5   : > { %v3036_v10 = vmul.f32 %v4057_v15, %v3025_v63 }
 0x8b7   : > { %v3038_v23 = vpack.c.bf16 %v3036_v10, %v3036_v10 }
 0x8b9   : > { %3818 = vmatmul.mubr.msk.bf16.vlgmr.msra.gmra.mxu0 %vm2286_vm8, %v3038_v23 }
 0x8ba   : > { %3833 = vmatprep.mubr.msk.bf16.mxu0 %vm4114_vm5, %v4113_v54  ;;  %3832 = vmatpush3.bf16.msra.mxu0 %v3941_v20 }
 0x979   : > { %v3080_v57 = vpop.f32.mrf.mxu0 }
 0x97a   : > { %v3081_v38 = vadd.f32 %v3080_v57, %v3039_v41 }
 0x97b   : > { %v3819_v19 = vpop.f32.mrf.mxu0 }
 0x97c   : > { %v3536_v40 = vmul.f32 -1.442695, %v3081_v38 }
 0x97d   : > { %v3083_v11 = vpop.f32.mrf.mxu0 }
 0x97e   : > { %4058 = vpow2.f32 %v3536_v40 }
 0x97f   : > { %v3820_v13 = vpop.f32.mrf.mxu0 }
 0x98b   : > { %v4059_v55 = vpop.eup %4058 }
 0x98c   : > { %v3089_v44 = vadd.f32 1.0, %v4059_v55 }
 0x98e   : > { %4060 = vrcp.f32 %v3089_v44 }
 0x99b   : > { %v4061_v27 = vpop.eup %4060 }
 0x99c   : > { %v3095_v52 = vrot.slane %v4061_v27, %v4424_v60 }
 0x99e   : > { %v3096_v53 = vmul.f32 %v3095_v52, %v2947_v18  ;;  %v3097_v50 = vmul.f32 %v3095_v52, %v2948_v37 }
 0x9a0   : > { %v3104_v54 = vpack.c.bf16 %v3097_v50, %v3096_v53 }
 0x9a2   : > { %3828 = vmatmul.mubr.msk.bf16.vlgmr.msra.gmra.mxu1 %vm2949_vm9, %v3104_v54 }
 0xa62   : > { %v3160_v46 = vpop.f32.mrf.mxu1 }
 0xa63   : > { %v3174_v35 = vmul.f32 %v3541_v28, %v3160_v46 }
 0xa64   : > { %v3829_v47 = vpop.f32.mrf.mxu1 }
 0xa65   : > { %v3183_v43 = vadd.f32 %v3542_v62, %v3174_v35 }
 0xa66   : > { %v3163_v34 = vpop.f32.mrf.mxu1 }
 0xa67   : > { %v3175_v21 = vmul.f32 %v3541_v28, %v3163_v34 }
 0xa68   : > { %v3830_v32 = vpop.f32.mrf.mxu1 }
 0xa69   : > { %v3184_v9 = vadd.f32 %v3542_v62, %v3175_v21 }
 0xa6b   : > { %v3187_v60 = vpack.c.bf16 %v3184_v9, %v3183_v43 }
 0xa6d   : > { %3834 = vmatmul.mubr.msk.bf16.vlgmr.msra.gmra.mxu0 %vm3194_vm10, %v3187_v60 }
 0xb2d   : > { %v3232_v14 = vpop.f32.mrf.mxu0 }
 0xb2e   : > { %v3246_v45 = vmul.f32 %v3545_v16, %v3232_v14 }
 0xb2f   : > { %v3835_v31 = vpop.f32.mrf.mxu0 }
 0xb30   : > { %v3255_v24 = vadd.f32 %v3546_v12, %v3246_v45 }
 0xb31   : > { %v3235_v58 = vpop.f32.mrf.mxu0 }
 0xb32   : > { %v3547_v18 = vmul.f32 -1.442695, %v3255_v24  ;;  %v3247_v22 = vmul.f32 %v3545_v16, %v3235_v58 }
 0xb33   : > { %v3836_v37 = vpop.f32.mrf.mxu0 }
 0xb34   : > { %4062 = vpow2.f32 %v3547_v18  ;;  %v3256_v3 = vadd.f32 %v3546_v12, %v3247_v22 }
 0xb36   : > { %v3548_v61 = vmul.f32 -1.442695, %v3256_v3 }
 0xb38   : > { %4064 = vpow2.f32 %v3548_v61 }
 0xb41   : > { %v4063_v56 = vpop.eup %4062 }
 0xb42   : > { %v3263_v5 = vadd.f32 1.0, %v4063_v56 }
 0xb44   : > { %4066 = vrcp.f32 %v3263_v5 }
 0xb45   : > { %v4065_v51 = vpop.eup %4064 }
 0xb46   : > { %v3264_v59 = vadd.f32 1.0, %v4065_v51 }
 0xb48   : > { %4068 = vrcp.f32 %v3264_v59 }
 0xb51   : > { %v4067_v6 = vpop.eup %4066 }
 0xb52   : > { %v3269_v39 = vmul.f32 %v4067_v6, %v3255_v24 }
 0xb54   : > { %v3272_v42 = vsel %vm3271_vm11, %v3269_v39, 0.0 }
 0xb55   : > { %v4069_v2 = vpop.eup %4068 }
 0xb56   : > { %v3270_v1 = vmul.f32 %v4069_v2, %v3256_v3 }
 0xb58   : > { %v3273_v7 = vsel %vm3271_vm11, %v3270_v1, 0.0 }
 0xb59   : > { %v3274_v36 = vadd.f32 %v3273_v7, %v3272_v42 }
 0xb5b   : > { %v3275_v8 = vrot.slane %v3274_v36, 4 }
 0xb5d   : > { %v3276_v0 = vadd.f32 %v3275_v8, %v3274_v36 }
 0xb5f   : > { %v3277_v17 = vrot.slane %v3276_v0, 2 }
 0xb61   : > { %v3278_v30 = vadd.f32 %v3277_v17, %v3276_v0 }
 0xb63   : > { %v3279_v48 = vrot.slane %v3278_v30, 1 }
 0xb65   : > { %v3280_v63 = vadd.f32 %v3279_v48, %v3278_v30 }
 0xb67   : > { %v3281_v29 = vmul.f32 0.0625, %v3280_v63 }
 0xb69   : > { %v3283_v33 = vmul.f32 %v3282_v49, %v3281_v29 }
 0xb6b   : > { %v3285_v26 = vsel %vm3284_vm12, %v3283_v33, 0.0 }
 0xb6c   : > { %3286 = vadd.xlane.f32.xlu0 %v3285_v26 }
 0xbf5   : > { %v3287_v25 = vpop.xlane.xlu0 %3286 }
 0xbf6   : > { %v3289_v15 = vadd.f32 %v3288_v4, %v3287_v25 }
 0xbf8   : > { %3291 = vst.msk [vmem:[%s1040_s7] sm:$0x1] %vm3290_vm13, %v3289_v15 }
 0xbf9 PF: > { %s81_s15 = sadd.s32 1, %s4076_s15  }
 0xbfa   : > { %p78_p4 = scmp.ge.s32.totalorder %s81_s15, 4  }
 0xbfc   :  { %80 = sbr.rel (!%p78_p4) target bundleno = 63 (0x3f), region = 220 }

</bundles_post_ra>
